<compile_context>
chip_gen: v7x
topology: tpu7x:2x2x1
jax: 0.10.0
libtpu: 0.0.40
codegen_flags: <defaults>
</compile_context>

<pallas_src>
import functools

import jax
import jax.numpy as jnp
from jax.experimental import pallas as pl
from jax.experimental.pallas import tpu as pltpu

TAU = 0.2
EPS = 1e-12

# Keep per-step VMEM comfortably below the smallest default scoped limit across
# generations (16 MiB on v5e, 32 MiB on v6e/v7x) so no vmem_limit bump is needed.
_VMEM_BUDGET_BYTES = 12 * 1024 * 1024


def _round_up(x, m):
    return ((x + m - 1) // m) * m


def _vmem_bytes(t, d, in_itemsize, n_pad):
    inputs = 2 * 2 * t * d * in_itemsize      # h1n/h2n tiles, double-buffered
    temps = 2 * t * t * 4                     # sim + exp(sim) f32 temporaries
    outs = 2 * n_pad * 4 + 2 * t * 4          # resident colsum row block + logrow block
    scratch = t * 4                           # rowsum accumulator
    return inputs + temps + outs + scratch


def _select_tile(n, d, in_itemsize, block):
    """Largest square tile <= `block` that fits the conservative VMEM budget."""
    cands = sorted({c for c in (128, 256, 512) if c <= block} | {block}, reverse=True)
    t = cands[-1]
    for c in cands:
        if _vmem_bytes(c, d, in_itemsize, _round_up(n, c)) <= _VMEM_BUDGET_BYTES:
            t = c
            break
    if n < t:                                  # tiny problems: one small padded tile
        t = max(_round_up(n, 16), 16)
    return t


def _contrast_kernel(h1_ref, h2_ref, colsum_ref, logrow_ref, rowsum_scr,
                     *, n_valid, tile, padded):
    i = pl.program_id(0)            # anchor (query) row tile
    j = pl.program_id(1)            # sample (key)  column tile
    nj = pl.num_programs(1)

    # Normalization and 1/tau are hoisted to the wrapper: the refs already hold
    # h1n/tau and h2n (optionally bf16), so the kernel is pure MXU + exp + sums.
    sim = jax.lax.dot_general(
        h1_ref[...], h2_ref[...],
        dimension_numbers=(((1,), (1,)), ((), ())),       # 'NT' form, no transpose copy
        preferred_element_type=jnp.float32)                # (t, t), f32 accumulation
    # |sim| <= 1/tau = 5, so exp() cannot overflow -> no max-subtraction needed.
    exp_sim = jnp.exp(sim)

    if padded:
        # Zero the contributions of padded anchor rows and padded sample columns.
        row_idx = i * tile + jax.lax.broadcasted_iota(jnp.int32, (tile, tile), 0)
        col_idx = j * tile + jax.lax.broadcasted_iota(jnp.int32, (tile, tile), 1)
        exp_sim = jnp.where((row_idx < n_valid) & (col_idx < n_valid), exp_sim, 0.0)

    # Direction-2 denominators: this tile's column sums, written into the row tile's
    # resident lane-dense (1, 1, N_pad) output block (one writeback DMA per row tile).
    colsum_ref[:, :, pl.ds(pl.multiple_of(j * tile, tile), tile)] = (
        jnp.sum(exp_sim, axis=0, keepdims=True)[None])

    # Direction-1 denominators: running row sums across the (inner) column-tile loop.
    @pl.when(j == 0)
    def _init_rowsum():
        rowsum_scr[...] = jnp.zeros_like(rowsum_scr)

    rowsum_scr[...] = rowsum_scr[...] + jnp.sum(exp_sim, axis=1, keepdims=True)

    # Row sums complete at the last column tile -> emit per-row log denominators.
    @pl.when(j == nj - 1)
    def _finalize_rows():
        logrow_ref[...] = jnp.log(rowsum_scr[...])


def dual_branch_contrast(h1, h2, *, block=256, use_bf16_matmul=False):
    """0.5 * (InfoNCE(h1->h2) + InfoNCE(h2->h1)) with eye positives (HLCL 'L2L' mode)."""
    n, d = h1.shape
    assert h2.shape == (n, d)

    # --- O(N*D) prologue (plain XLA): normalize once, fold 1/tau into the anchors,
    # and compute the positive (diagonal) term in f32.
    h1f = h1.astype(jnp.float32)
    h2f = h2.astype(jnp.float32)
    eps_sq = jnp.float32(EPS * EPS)
    # F.normalize: x / max(||x||, eps) == x * rsqrt(max(||x||^2, eps^2)).
    s1 = jax.lax.rsqrt(jnp.maximum(jnp.sum(h1f * h1f, -1, keepdims=True), eps_sq))
    s2 = jax.lax.rsqrt(jnp.maximum(jnp.sum(h2f * h2f, -1, keepdims=True), eps_sq))
    h1n = h1f * (s1 * jnp.float32(1.0 / TAU))   # anchors carry the 1/tau scale
    h2n = h2f * s2
    diag = jnp.sum(h1n * h2n, axis=-1)          # (n,), sim_ii / tau, kept in f32

    # bf16 MXU feed (recommended on v6e/v7x): ~2-3x matmul throughput + half the tile DMA.
    kdtype = jnp.bfloat16 if use_bf16_matmul else jnp.float32
    itemsize = jnp.dtype(kdtype).itemsize
    h1k = h1n.astype(kdtype)
    h2k = h2n.astype(kdtype)

    # --- tile selection + padding (replaces the old whole-array fallback).
    t = _select_tile(n, d, itemsize, block)
    nt = (n + t - 1) // t
    n_pad = nt * t
    padded = n_pad != n
    if padded:
        h1k = jnp.pad(h1k, ((0, n_pad - n), (0, 0)))
        h2k = jnp.pad(h2k, ((0, n_pad - n), (0, 0)))

    kernel = functools.partial(_contrast_kernel, n_valid=n, tile=t, padded=padded)

    cost = pl.CostEstimate(
        flops=2 * n_pad * n_pad * d,
        transcendentals=n_pad * n_pad,
        bytes_accessed=(n_pad * d + nt * n_pad * d) * itemsize
                       + (nt * n_pad + n_pad) * 4)

    colsum_part, log_rowsum = pl.pallas_call(
        kernel,
        out_shape=(
            jax.ShapeDtypeStruct((nt, 1, n_pad), jnp.float32),  # per-row-tile col sums
            jax.ShapeDtypeStruct((n_pad, 1), jnp.float32),      # log(row sums of exp(sim))
        ),
        grid=(nt, nt),
        in_specs=[
            pl.BlockSpec((t, d), lambda i, j: (i, 0)),   # anchor rows (resident over j)
            pl.BlockSpec((t, d), lambda i, j: (j, 0)),   # sample rows (streamed over j)
        ],
        out_specs=[
            pl.BlockSpec((1, 1, n_pad), lambda i, j: (i, 0, 0)),  # resident over j
            pl.BlockSpec((t, 1), lambda i, j: (i, 0)),
        ],
        scratch_shapes=[pltpu.VMEM((t, 1), jnp.float32)],
        compiler_params=pltpu.CompilerParams(
            dimension_semantics=("parallel", "arbitrary")),
        cost_estimate=cost,
    )(h1k, h2k)

    # O(N) epilogue: combine partials into the scalar loss (padded rows/cols sliced away).
    log_colsum = jnp.log(jnp.sum(colsum_part[:, 0, :n], axis=0))     # (n,)
    log_rowsum = log_rowsum[:n, 0]                                   # (n,)
    return 0.5 * (jnp.mean(log_rowsum) + jnp.mean(log_colsum)) - jnp.mean(diag)


def _reference(h1, h2):
    """Plain-JAX reference mirroring the PyTorch semantics."""
    h1 = h1.astype(jnp.float32)
    h2 = h2.astype(jnp.float32)
    h1n = h1 / jnp.maximum(jnp.linalg.norm(h1, axis=-1, keepdims=True), EPS)
    h2n = h2 / jnp.maximum(jnp.linalg.norm(h2, axis=-1, keepdims=True), EPS)
    n = h1.shape[0]
    eye = jnp.eye(n, dtype=jnp.float32)

    def one_dir(a, s):
        sim = jnp.matmul(a, s.T, precision=jax.lax.Precision.HIGHEST) / TAU
        exp_sim = jnp.exp(sim)                       # (pos + neg) mask == ones
        log_prob = sim - jnp.log(exp_sim.sum(axis=1, keepdims=True))
        loss = (log_prob * eye).sum(axis=1) / eye.sum(axis=1)
        return -loss.mean()

    return 0.5 * (one_dir(h1n, h2n) + one_dir(h2n, h1n))


# TODO(synk): the sampler's intraview_negs='simple'/'origin' and explicit neg_mask branches
# are not exercised by the default HLCL L2L forward and are not implemented here.

if __name__ == "__main__":
    key = jax.random.PRNGKey(0)
    ks = jax.random.split(key, 8)

    # 1) Exact-multiple path: N=256, D=64 -> single 256x256 sim tile (default block=256).
    h1 = jax.random.normal(ks[0], (256, 64), dtype=jnp.float32)
    h2 = jax.random.normal(ks[1], (256, 64), dtype=jnp.float32)
    loss = jax.block_until_ready(dual_branch_contrast(h1, h2))
    ref = jax.block_until_ready(_reference(h1, h2))
    assert jnp.allclose(loss, ref, atol=1e-4, rtol=1e-4), (loss, ref)

    # 2) Padded/masked path: N=384 -> padded to 512, 2x2 grid of 256x256 tiles.
    h1 = jax.random.normal(ks[2], (384, 64), dtype=jnp.float32)
    h2 = jax.random.normal(ks[3], (384, 64), dtype=jnp.float32)
    loss = jax.block_until_ready(dual_branch_contrast(h1, h2))
    ref = jax.block_until_ready(_reference(h1, h2))
    assert jnp.allclose(loss, ref, atol=1e-4, rtol=1e-4), (loss, ref)

    # 3) Tiny problem: N=8, D=32 -> single padded 16x16 tile.
    h1 = jax.random.normal(ks[4], (8, 32), dtype=jnp.float32)
    h2 = jax.random.normal(ks[5], (8, 32), dtype=jnp.float32)
    loss = jax.block_until_ready(dual_branch_contrast(h1, h2))
    ref = jax.block_until_ready(_reference(h1, h2))
    assert jnp.allclose(loss, ref, atol=1e-4, rtol=1e-4), (loss, ref)

    # 4) bf16 MXU feed (v6e/v7x fast path), f32 accumulation -> looser tolerance.
    h1 = jax.random.normal(ks[6], (256, 64), dtype=jnp.float32)
    h2 = jax.random.normal(ks[7], (256, 64), dtype=jnp.float32)
    loss = jax.block_until_ready(dual_branch_contrast(h1, h2, use_bf16_matmul=True))
    ref = jax.block_until_ready(_reference(h1, h2))
    assert jnp.allclose(loss, ref, atol=2e-2, rtol=2e-2), (loss, ref)

    print("KERNEL_OK")
</pallas_src>

<mosaic_0001>
module attributes {stable_mosaic.version = 11 : i64} {
  func.func @_contrast_kernel(%arg0: i32, %arg1: i32, %arg2: memref<256x64xf32, #tpu.memory_space<vmem>>, %arg3: memref<256x64xf32, #tpu.memory_space<vmem>>, %arg4: memref<1x1x256xf32, #tpu.memory_space<vmem>>, %arg5: memref<256x1xf32, #tpu.memory_space<vmem>>, %arg6: memref<256x1xf32, #tpu.memory_space<vmem>>) attributes {dimension_semantics = [#tpu.dimension_semantics<parallel>, #tpu.dimension_semantics<arbitrary>], iteration_bounds = array<i64: 1, 1>, scalar_prefetch = 0 : i64, scratch_operands = 1 : i64, tpu.core_type = #tpu.core_type<tc>, window_params = [{transform_indices = @transform_0, window_bounds = array<i64: 256, 64>}, {transform_indices = @transform_1, window_bounds = array<i64: 256, 64>}, {transform_indices = @transform_2, window_bounds = array<i64: 1, 1, 256>}, {transform_indices = @transform_3, window_bounds = array<i64: 256, 1>}]} {
    %c0 = arith.constant 0 : index
    %c0_0 = arith.constant 0 : index
    %0 = vector.load %arg2[%c0, %c0_0] : memref<256x64xf32, #tpu.memory_space<vmem>>, vector<256x64xf32>
    %c0_1 = arith.constant 0 : index
    %c0_2 = arith.constant 0 : index
    %1 = vector.load %arg3[%c0_1, %c0_2] : memref<256x64xf32, #tpu.memory_space<vmem>>, vector<256x64xf32>
    %cst = arith.constant dense<0.000000e+00> : vector<256x256xf32>
    %2 = tpu.matmul %0, %1, %cst {dimension_numbers = #tpu.dot_dimension_numbers<[1], [1], [0], [0], [0, 0, 1, 0], [], []>} : vector<256x64xf32>, vector<256x64xf32>, vector<256x256xf32> -> vector<256x256xf32>
    %3 = math.exp %2 : vector<256x256xf32>
    %cst_3 = arith.constant dense<0.000000e+00> : vector<256xf32>
    %4 = vector.multi_reduction <add>, %3, %cst_3 [0] : vector<256x256xf32> to vector<256xf32>
    %5 = vector.shape_cast %4 : vector<256xf32> to vector<1x256xf32>
    %6 = vector.shape_cast %5 : vector<1x256xf32> to vector<1x1x256xf32>
    %c256_i32 = arith.constant 256 : i32
    %7 = arith.muli %arg1, %c256_i32 : i32
    %8 = tpu.assume_multiple %7, 256 : i32
    %c0_4 = arith.constant 0 : index
    %c0_5 = arith.constant 0 : index
    %9 = arith.index_cast %8 : i32 to index
    %10 = vector.load %arg4[%c0_4, %c0_5, %9] : memref<1x1x256xf32, #tpu.memory_space<vmem>>, vector<1x1x256xf32>
    tpu.vector_store %arg4[%c0_4, %c0_5, %9], %6 {strides = array<i32>} : memref<1x1x256xf32, #tpu.memory_space<vmem>>, vector<1x1x256xf32>,
    %c0_i32 = arith.constant 0 : i32
    %11 = arith.cmpi eq, %arg1, %c0_i32 : i32
    %12 = arith.extui %11 : i1 to i32
    %c0_i32_6 = arith.constant 0 : i32
    %13 = arith.cmpi ne, %12, %c0_i32_6 : i32
    scf.if %13 {
      %cst_14 = arith.constant 0.000000e+00 : f32
      %22 = vector.broadcast %cst_14 : f32 to vector<256x1xf32>
      %c0_15 = arith.constant 0 : index
      %c0_16 = arith.constant 0 : index
      %23 = vector.load %arg6[%c0_15, %c0_16] : memref<256x1xf32, #tpu.memory_space<vmem>>, vector<256x1xf32>
      tpu.vector_store %arg6[%c0_15, %c0_16], %22 {strides = array<i32>} : memref<256x1xf32, #tpu.memory_space<vmem>>, vector<256x1xf32>,
    } else {
    }
    %c0_7 = arith.constant 0 : index
    %c0_8 = arith.constant 0 : index
    %14 = vector.load %arg6[%c0_7, %c0_8] : memref<256x1xf32, #tpu.memory_space<vmem>>, vector<256x1xf32>
    %cst_9 = arith.constant dense<0.000000e+00> : vector<256xf32>
    %15 = vector.multi_reduction <add>, %3, %cst_9 [1] : vector<256x256xf32> to vector<256xf32>
    %16 = vector.shape_cast %15 : vector<256xf32> to vector<256x1xf32>
    %17 = arith.addf %14, %16 : vector<256x1xf32>
    %c0_10 = arith.constant 0 : index
    %c0_11 = arith.constant 0 : index
    %18 = vector.load %arg6[%c0_10, %c0_11] : memref<256x1xf32, #tpu.memory_space<vmem>>, vector<256x1xf32>
    tpu.vector_store %arg6[%c0_10, %c0_11], %17 {strides = array<i32>} : memref<256x1xf32, #tpu.memory_space<vmem>>, vector<256x1xf32>,
    %c0_i32_12 = arith.constant 0 : i32
    %19 = arith.cmpi eq, %arg1, %c0_i32_12 : i32
    %20 = arith.extui %19 : i1 to i32
    %c0_i32_13 = arith.constant 0 : i32
    %21 = arith.cmpi ne, %20, %c0_i32_13 : i32
    scf.if %21 {
      %c0_14 = arith.constant 0 : index
      %c0_15 = arith.constant 0 : index
      %22 = vector.load %arg6[%c0_14, %c0_15] : memref<256x1xf32, #tpu.memory_space<vmem>>, vector<256x1xf32>
      %23 = math.log %22 : vector<256x1xf32>
      %c0_16 = arith.constant 0 : index
      %c0_17 = arith.constant 0 : index
      %24 = vector.load %arg5[%c0_16, %c0_17] : memref<256x1xf32, #tpu.memory_space<vmem>>, vector<256x1xf32>
      tpu.vector_store %arg5[%c0_16, %c0_17], %23 {strides = array<i32>} : memref<256x1xf32, #tpu.memory_space<vmem>>, vector<256x1xf32>,
    } else {
    }
    return
  }
  func.func @transform_0(%arg0: i32, %arg1: i32) -> (i32, i32) {
    %c0_i32 = arith.constant 0 : i32
    %c0_i32_0 = arith.constant 0 : i32
    return %arg0, %c0_i32 : i32, i32
  }
  func.func @transform_1(%arg0: i32, %arg1: i32) -> (i32, i32) {
    %c0_i32 = arith.constant 0 : i32
    %c0_i32_0 = arith.constant 0 : i32
    return %arg1, %c0_i32 : i32, i32
  }
  func.func @transform_2(%arg0: i32, %arg1: i32) -> (i32, i32, i32) {
    %c0_i32 = arith.constant 0 : i32
    %c0_i32_0 = arith.constant 0 : i32
    %c0_i32_1 = arith.constant 0 : i32
    return %arg0, %c0_i32, %c0_i32_0 : i32, i32, i32
  }
  func.func @transform_3(%arg0: i32, %arg1: i32) -> (i32, i32) {
    %c0_i32 = arith.constant 0 : i32
    %c0_i32_0 = arith.constant 0 : i32
    return %arg0, %c0_i32 : i32, i32
  }
}

</mosaic_0001>

<bundles_post_ra>
// kernel: tpu_custom_call.1
= control target key start
LH: loop header
LB: loop body
LE: loop exit
PB: predicated region body
PF: predicated region fallthrough
CT: control target
= control target key end

     0   :  { %vm78_vm0 = vcmask 523264   ;;  %s2245_s0 = inlined_call_operand.vmem [shape: f32[256,64], index: 0, kind: input, shape index: {}]   ;;  %s2246_s1 = inlined_call_operand.vmem [shape: f32[256,64], index: 1, kind: input, shape index: {}]   ;;  %s2247_s2 = inlined_call_operand.hbm [shape: f32[1,1,256], index: 2, kind: output, shape index: {0}]   ;;  %s2248_s3 = inlined_call_operand.vmem [shape: f32[256,1], index: 3, kind: output, shape index: {1}]  }
   0x1   :  { %v62_v0 = vld [vmem:[%s2246_s1 + $0x80] sm:$0xff]  ;;  %v63_v1 = vld [vmem:[%s2246_s1 + $0x88] sm:$0xff]  ;;  %vm1614_vm1 = vmpackc.low %vm78_vm0, %vm78_vm0 }
   0x2   :  { %v46_v2 = vld [vmem:[%s2246_s1] sm:$0xff]  ;;  %v1297_v3 = vpack.c.bf16 %v63_v1, %v62_v0  ;;  %v47_v5 = vld [vmem:[%s2246_s1 + $0x8] sm:$0xff]  ;;  %v64_v6 = vld [vmem:[%s2246_s1 + $0x90] sm:$0xff] }
   0x3   :  { %v1300_v7 = vpack.c.bf16 %v47_v5, %v46_v2  ;;  %v65_v8 = vld [vmem:[%s2246_s1 + $0x98] sm:$0xff]  ;;  %v48_v10 = vld [vmem:[%s2246_s1 + $0x10] sm:$0xff]  ;;  %v66_v12 = vld [vmem:[%s2246_s1 + $0xa0] sm:$0xff] }
   0x4   :  { %1299 = vmatprep.subr.msk.bf16.mxu0 %vm1614_vm1, %v1297_v3  ;;  %1345 = vmatprep.subr.msk.bf16.mxu1 %vm1614_vm1, %v1297_v3  ;;  %v1303_v9 = vpack.c.bf16 %v65_v8, %v64_v6  ;;  %v49_v11 = vld [vmem:[%s2246_s1 + $0x18] sm:$0xff]  ;;  %v67_v13 = vld [vmem:[%s2246_s1 + $0xa8] sm:$0xff]  ;;  %v1654_v16 = vld [vmem:[%s2245_s0] sm:$0xff] }
   0x5   :  { %1302 = vmatpush3.bf16.xpose.msk.msra.mxu0 %vm1614_vm1, %v1300_v7  ;;  %1353 = vmatpush3.bf16.xpose.msk.msra.mxu1 %vm1614_vm1, %v1300_v7  ;;  %v1306_v14 = vpack.c.bf16 %v49_v11, %v48_v10  ;;  %v1309_v15 = vpack.c.bf16 %v67_v13, %v66_v12  ;;  %v1659_v17 = vld [vmem:[%s2245_s0 + $0x80] sm:$0xff]  ;;  %v51_v19 = vld [vmem:[%s2246_s1 + $0x28] sm:$0xff]  ;;  %v68_v20 = vld [vmem:[%s2246_s1 + $0xb0] sm:$0xff] }
   0x6   :  { %1305 = vmatprep.subr.msk.bf16.mxu0 %vm1614_vm1, %v1303_v9  ;;  %1346 = vmatprep.subr.msk.bf16.mxu1 %vm1614_vm1, %v1303_v9  ;;  %v50_v18 = vld [vmem:[%s2246_s1 + $0x20] sm:$0xff]  ;;  %v69_v21 = vld [vmem:[%s2246_s1 + $0xb8] sm:$0xff]  ;;  %v52_v24 = vld [vmem:[%s2246_s1 + $0x30] sm:$0xff] }
   0x7   :  { %1233 = vmatprep.mubr.msk.f32.mxu0 %vm78_vm0, %v1654_v16  ;;  %1265 = vmatprep.mubr.msk.f32.mxu1 %vm78_vm0, %v1659_v17  ;;  %v1312_v22 = vpack.c.bf16 %v51_v19, %v50_v18  ;;  %v1315_v23 = vpack.c.bf16 %v69_v21, %v68_v20  ;;  %v53_v25 = vld [vmem:[%s2246_s1 + $0x38] sm:$0xff] }
   0xd   :  { %1308 = vmatpush3.bf16.xpose.msk.msra.mxu0 %vm1614_vm1, %v1306_v14  ;;  %1354 = vmatpush3.bf16.xpose.msk.msra.mxu1 %vm1614_vm1, %v1306_v14 }
   0xe   :  { %1311 = vmatprep.subr.msk.bf16.mxu0 %vm1614_vm1, %v1309_v15  ;;  %1347 = vmatprep.subr.msk.bf16.mxu1 %vm1614_vm1, %v1309_v15 }
  0x15   :  { %1314 = vmatpush3.bf16.xpose.msk.msra.mxu0 %vm1614_vm1, %v1312_v22  ;;  %1355 = vmatpush3.bf16.xpose.msk.msra.mxu1 %vm1614_vm1, %v1312_v22 }
  0x16   :  { %1317 = vmatprep.subr.msk.bf16.mxu0 %vm1614_vm1, %v1315_v23  ;;  %1348 = vmatprep.subr.msk.bf16.mxu1 %vm1614_vm1, %v1315_v23 }
  0x17   :  { %9 = vsyncpa [#allocation4], 0  ;;  %v70_v26 = vld [vmem:[%s2246_s1 + $0xc0] sm:$0xff]  ;;  %v71_v27 = vld [vmem:[%s2246_s1 + $0xc8] sm:$0xff]  ;;  %v1318_v28 = vpack.c.bf16 %v53_v25, %v52_v24  ;;  %vm761_vm2 = vcmask 7168  }
  0x18   :  { %v1321_v29 = vpack.c.bf16 %v71_v27, %v70_v26  ;;  %v54_v30 = vld [vmem:[%s2246_s1 + $0x40] sm:$0xff]  ;;  %v55_v31 = vld [vmem:[%s2246_s1 + $0x48] sm:$0xff]  ;;  %v72_v32 = vld [vmem:[%s2246_s1 + $0xd0] sm:$0xff] }
  0x19   :  { %v73_v33 = vld [vmem:[%s2246_s1 + $0xd8] sm:$0xff]  ;;  %v1324_v34 = vpack.c.bf16 %v55_v31, %v54_v30  ;;  %v56_v36 = vld [vmem:[%s2246_s1 + $0x50] sm:$0xff]  ;;  %v74_v38 = vld [vmem:[%s2246_s1 + $0xe0] sm:$0xff] }
  0x1a   :  { %v1327_v35 = vpack.c.bf16 %v73_v33, %v72_v32  ;;  %v57_v37 = vld [vmem:[%s2246_s1 + $0x58] sm:$0xff]  ;;  %v75_v39 = vld [vmem:[%s2246_s1 + $0xe8] sm:$0xff]  ;;  %v58_v42 = vld [vmem:[%s2246_s1 + $0x60] sm:$0xff] }
  0x1b   :  { %v1330_v40 = vpack.c.bf16 %v57_v37, %v56_v36  ;;  %v1333_v41 = vpack.c.bf16 %v75_v39, %v74_v38  ;;  %v59_v43 = vld [vmem:[%s2246_s1 + $0x68] sm:$0xff]  ;;  %v76_v44 = vld [vmem:[%s2246_s1 + $0xf0] sm:$0xff]  ;;  %v77_v45 = vld [vmem:[%s2246_s1 + $0xf8] sm:$0xff] }
  0x1c   :  { %v1336_v46 = vpack.c.bf16 %v59_v43, %v58_v42  ;;  %v1339_v47 = vpack.c.bf16 %v77_v45, %v76_v44  ;;  %v60_v48 = vld [vmem:[%s2246_s1 + $0x70] sm:$0xff]  ;;  %v61_v49 = vld [vmem:[%s2246_s1 + $0x78] sm:$0xff]  ;;  %v15_v51 = vld [vmem:[%s2245_s0 + $0x8] sm:$0xff] }
  0x1d   :  { %1320 = vmatpush3.bf16.xpose.msk.msra.mxu0 %vm1614_vm1, %v1318_v28  ;;  %1356 = vmatpush3.bf16.xpose.msk.msra.mxu1 %vm1614_vm1, %v1318_v28  ;;  %v1342_v50 = vpack.c.bf16 %v61_v49, %v60_v48  ;;  %v31_v52 = vld [vmem:[%s2245_s0 + $0x88] sm:$0xff]  ;;  %v16_v53 = vld [vmem:[%s2245_s0 + $0x10] sm:$0xff]  ;;  %v17_v55 = vld [vmem:[%s2245_s0 + $0x18] sm:$0xff] }
  0x1e   :  { %1323 = vmatprep.subr.msk.bf16.mxu0 %vm1614_vm1, %v1321_v29  ;;  %1349 = vmatprep.subr.msk.bf16.mxu1 %vm1614_vm1, %v1321_v29  ;;  %v32_v54 = vld [vmem:[%s2245_s0 + $0x90] sm:$0xff]  ;;  %v33_v56 = vld [vmem:[%s2245_s0 + $0x98] sm:$0xff]  ;;  %v18_v57 = vld [vmem:[%s2245_s0 + $0x20] sm:$0xff] }
  0x1f   :  { %v34_v58 = vld [vmem:[%s2245_s0 + $0xa0] sm:$0xff]  ;;  %v19_v59 = vld [vmem:[%s2245_s0 + $0x28] sm:$0xff]  ;;  %v20_v61 = vld [vmem:[%s2245_s0 + $0x30] sm:$0xff] }
  0x20   :  { %v35_v60 = vld [vmem:[%s2245_s0 + $0xa8] sm:$0xff]  ;;  %v36_v62 = vld [vmem:[%s2245_s0 + $0xb0] sm:$0xff]  ;;  %v21_v63 = vld [vmem:[%s2245_s0 + $0x38] sm:$0xff] }
  0x21   :  { %v37_v0 = vld [vmem:[%s2245_s0 + $0xb8] sm:$0xff]  ;;  %v22_v1 = vld [vmem:[%s2245_s0 + $0x40] sm:$0xff]  ;;  %v23_v3 = vld [vmem:[%s2245_s0 + $0x48] sm:$0xff] }
  0x22   :  { %v38_v2 = vld [vmem:[%s2245_s0 + $0xc0] sm:$0xff]  ;;  %v39_v4 = vld [vmem:[%s2245_s0 + $0xc8] sm:$0xff]  ;;  %v24_v5 = vld [vmem:[%s2245_s0 + $0x50] sm:$0xff] }
  0x23   :  { %v40_v6 = vld [vmem:[%s2245_s0 + $0xd0] sm:$0xff]  ;;  %v25_v7 = vld [vmem:[%s2245_s0 + $0x58] sm:$0xff]  ;;  %v26_v9 = vld [vmem:[%s2245_s0 + $0x60] sm:$0xff] }
  0x24   :  { %v41_v8 = vld [vmem:[%s2245_s0 + $0xd8] sm:$0xff]  ;;  %v42_v10 = vld [vmem:[%s2245_s0 + $0xe0] sm:$0xff]  ;;  %v27_v11 = vld [vmem:[%s2245_s0 + $0x68] sm:$0xff] }
  0x25   :  { %1326 = vmatpush3.bf16.xpose.msk.msra.mxu0 %vm1614_vm1, %v1324_v34  ;;  %1357 = vmatpush3.bf16.xpose.msk.msra.mxu1 %vm1614_vm1, %v1324_v34  ;;  %v43_v12 = vld [vmem:[%s2245_s0 + $0xe8] sm:$0xff]  ;;  %v28_v13 = vld [vmem:[%s2245_s0 + $0x70] sm:$0xff]  ;;  %v29_v15 = vld [vmem:[%s2245_s0 + $0x78] sm:$0xff] }
  0x26   :  { %1329 = vmatprep.subr.msk.bf16.mxu0 %vm1614_vm1, %v1327_v35  ;;  %1350 = vmatprep.subr.msk.bf16.mxu1 %vm1614_vm1, %v1327_v35  ;;  %v44_v14 = vld [vmem:[%s2245_s0 + $0xf0] sm:$0xff] }
  0x2d   :  { %1332 = vmatpush3.bf16.xpose.msk.msra.mxu0 %vm1614_vm1, %v1330_v40  ;;  %1358 = vmatpush3.bf16.xpose.msk.msra.mxu1 %vm1614_vm1, %v1330_v40 }
  0x2e   :  { %1335 = vmatprep.subr.msk.bf16.mxu0 %vm1614_vm1, %v1333_v41  ;;  %1351 = vmatprep.subr.msk.bf16.mxu1 %vm1614_vm1, %v1333_v41 }
  0x35   :  { %1338 = vmatpush3.bf16.xpose.msk.msra.mxu0 %vm1614_vm1, %v1336_v46  ;;  %1359 = vmatpush3.bf16.xpose.msk.msra.mxu1 %vm1614_vm1, %v1336_v46 }
  0x36   :  { %1341 = vmatprep.subr.msk.bf16.mxu0 %vm1614_vm1, %v1339_v47  ;;  %1352 = vmatprep.subr.msk.bf16.mxu1 %vm1614_vm1, %v1339_v47 }
  0x3d   :  { %1344 = vmatpush3.bf16.xpose.msk.msra.mxu0 %vm1614_vm1, %v1342_v50  ;;  %1360 = vmatpush3.bf16.xpose.msk.msra.mxu1 %vm1614_vm1, %v1342_v50 }
  0x44   :  { %1234 = vmatmul.mubr.msk.f32.vlgmr.msra.gmra.mrb[0].mxu0 %vm78_vm0, %v1654_v16  ;;  %1266 = vmatmul.mubr.msk.f32.vlgmr.msra.gmra.mrb[0].mxu1 %vm78_vm0, %v1659_v17  ;;  %v45_v16 = vld [vmem:[%s2245_s0 + $0xf8] sm:$0xff]  ;;  %v1580_v17 = vmov 0.0   ;;  %s1582_s0 = smov [#allocation3]  }
  0x45   :  { %1235 = vmatprep.mubr.msk.f32.mxu0 %vm78_vm0, %v15_v51  ;;  %1267 = vmatprep.mubr.msk.f32.mxu1 %vm78_vm0, %v31_v52  ;;  %762 = vst.msk [vmem:[#allocation2] sm:$0xff] %vm761_vm2, %v1580_v17  ;;  %763 = vst.msk [vmem:[#allocation2 + $0x8] sm:$0xff] %vm761_vm2, %v1580_v17  ;;  %s1124_s1 = sshll.u32 %s1582_s0, 4  ;;  %s1125_s1 = int_to_ptr.vmem [resolvable:$true] %s1124_s1 }
  0x46   :  { %764 = vst.msk [vmem:[#allocation2 + $0x10] sm:$0xff] %vm761_vm2, %v1580_v17  ;;  %765 = vst.msk [vmem:[#allocation2 + $0x18] sm:$0xff] %vm761_vm2, %v1580_v17  ;;  %s1556_s30 = scalar_lea.vmem %s1125_s1, 32  ;;  %p1561_p1 = scmp.lt.s32.totalorder %s1125_s1, %s1125_s1 }
  0x47   :  { %766 = vst.msk [vmem:[#allocation2 + $0x20] sm:$0xff] %vm761_vm2, %v1580_v17  ;;  %767 = vst.msk [vmem:[#allocation2 + $0x28] sm:$0xff] %vm761_vm2, %v1580_v17  ;;  %p1557_p0 = scmp.ne.s32.totalorder %s1125_s1, %s1556_s30  ;;  %p1562_p2 = scmp.lt.s32.totalorder %s1556_s30, %s1556_s30 }
  0x48   :  { %1236 = vmatmul.mubr.msk.f32.gmra.mrb[2].mxu0 %vm78_vm0, %v15_v51  ;;  %1268 = vmatmul.mubr.msk.f32.gmra.mrb[2].mxu1 %vm78_vm0, %v31_v52  ;;  %768 = vst.msk [vmem:[#allocation2 + $0x30] sm:$0xff] %vm761_vm2, %v1580_v17  ;;  %769 = vst.msk [vmem:[#allocation2 + $0x38] sm:$0xff] %vm761_vm2, %v1580_v17 }
  0x49   :  { %1237 = vmatprep.mubr.msk.f32.mxu0 %vm78_vm0, %v16_v53  ;;  %1269 = vmatprep.mubr.msk.f32.mxu1 %vm78_vm0, %v32_v54  ;;  %770 = vst.msk [vmem:[#allocation2 + $0x40] sm:$0xff] %vm761_vm2, %v1580_v17  ;;  %771 = vst.msk [vmem:[#allocation2 + $0x48] sm:$0xff] %vm761_vm2, %v1580_v17  ;;  %p1563_p3 = por %p1562_p2, %p1561_p1 }
  0x4a   :  { %772 = vst.msk [vmem:[#allocation2 + $0x50] sm:$0xff] %vm761_vm2, %v1580_v17  ;;  %773 = vst.msk [vmem:[#allocation2 + $0x58] sm:$0xff] %vm761_vm2, %v1580_v17 }
  0x4b   :  { %774 = vst.msk [vmem:[#allocation2 + $0x60] sm:$0xff] %vm761_vm2, %v1580_v17  ;;  %775 = vst.msk [vmem:[#allocation2 + $0x68] sm:$0xff] %vm761_vm2, %v1580_v17  ;;  %p1564_p4 = pnand %p1563_p3, %p1557_p0 }
  0x4c   :  { %1238 = vmatmul.mubr.msk.f32.gmra.mrb[4].mxu0 %vm78_vm0, %v16_v53  ;;  %1270 = vmatmul.mubr.msk.f32.gmra.mrb[4].mxu1 %vm78_vm0, %v32_v54  ;;  %776 = vst.msk [vmem:[#allocation2 + $0x70] sm:$0xff] %vm761_vm2, %v1580_v17  ;;  %777 = vst.msk [vmem:[#allocation2 + $0x78] sm:$0xff] %vm761_vm2, %v1580_v17 }
  0x4d   :  { %1239 = vmatprep.mubr.msk.f32.mxu0 %vm78_vm0, %v17_v55  ;;  %1271 = vmatprep.mubr.msk.f32.mxu1 %vm78_vm0, %v33_v56  ;;  %778 = vst.msk [vmem:[#allocation2 + $0x80] sm:$0xff] %vm761_vm2, %v1580_v17  ;;  %779 = vst.msk [vmem:[#allocation2 + $0x88] sm:$0xff] %vm761_vm2, %v1580_v17 }
  0x4e   :  { %780 = vst.msk [vmem:[#allocation2 + $0x90] sm:$0xff] %vm761_vm2, %v1580_v17  ;;  %781 = vst.msk [vmem:[#allocation2 + $0x98] sm:$0xff] %vm761_vm2, %v1580_v17 }
  0x4f   :  { %782 = vst.msk [vmem:[#allocation2 + $0xa0] sm:$0xff] %vm761_vm2, %v1580_v17  ;;  %783 = vst.msk [vmem:[#allocation2 + $0xa8] sm:$0xff] %vm761_vm2, %v1580_v17 }
  0x50   :  { %1240 = vmatmul.mubr.msk.f32.gmra.mrb[6].mxu0 %vm78_vm0, %v17_v55  ;;  %1272 = vmatmul.mubr.msk.f32.gmra.mrb[6].mxu1 %vm78_vm0, %v33_v56  ;;  %784 = vst.msk [vmem:[#allocation2 + $0xb0] sm:$0xff] %vm761_vm2, %v1580_v17  ;;  %785 = vst.msk [vmem:[#allocation2 + $0xb8] sm:$0xff] %vm761_vm2, %v1580_v17 }
  0x51   :  { %1241 = vmatprep.mubr.msk.f32.mxu0 %vm78_vm0, %v18_v57  ;;  %1273 = vmatprep.mubr.msk.f32.mxu1 %vm78_vm0, %v34_v58  ;;  %786 = vst.msk [vmem:[#allocation2 + $0xc0] sm:$0xff] %vm761_vm2, %v1580_v17  ;;  %787 = vst.msk [vmem:[#allocation2 + $0xc8] sm:$0xff] %vm761_vm2, %v1580_v17 }
  0x52   :  { %788 = vst.msk [vmem:[#allocation2 + $0xd0] sm:$0xff] %vm761_vm2, %v1580_v17  ;;  %789 = vst.msk [vmem:[#allocation2 + $0xd8] sm:$0xff] %vm761_vm2, %v1580_v17 }
  0x53   :  { %790 = vst.msk [vmem:[#allocation2 + $0xe0] sm:$0xff] %vm761_vm2, %v1580_v17  ;;  %791 = vst.msk [vmem:[#allocation2 + $0xe8] sm:$0xff] %vm761_vm2, %v1580_v17 }
  0x54   :  { %1242 = vmatmul.mubr.msk.f32.gmra.mrb[8].mxu0 %vm78_vm0, %v18_v57  ;;  %1274 = vmatmul.mubr.msk.f32.gmra.mrb[8].mxu1 %vm78_vm0, %v34_v58  ;;  %792 = vst.msk [vmem:[#allocation2 + $0xf0] sm:$0xff] %vm761_vm2, %v1580_v17  ;;  %793 = vst.msk [vmem:[#allocation2 + $0xf8] sm:$0xff] %vm761_vm2, %v1580_v17 }
  0x55   :  { %1243 = vmatprep.mubr.msk.f32.mxu0 %vm78_vm0, %v19_v59  ;;  %1275 = vmatprep.mubr.msk.f32.mxu1 %vm78_vm0, %v35_v60 }
  0x58   :  { %1244 = vmatmul.mubr.msk.f32.gmra.mrb[10].mxu0 %vm78_vm0, %v19_v59  ;;  %1276 = vmatmul.mubr.msk.f32.gmra.mrb[10].mxu1 %vm78_vm0, %v35_v60 }
  0x59   :  { %1245 = vmatprep.mubr.msk.f32.mxu0 %vm78_vm0, %v20_v61  ;;  %1277 = vmatprep.mubr.msk.f32.mxu1 %vm78_vm0, %v36_v62 }
  0x5c   :  { %1246 = vmatmul.mubr.msk.f32.gmra.mrb[12].mxu0 %vm78_vm0, %v20_v61  ;;  %1278 = vmatmul.mubr.msk.f32.gmra.mrb[12].mxu1 %vm78_vm0, %v36_v62 }
  0x5d   :  { %1247 = vmatprep.mubr.msk.f32.mxu0 %vm78_vm0, %v21_v63  ;;  %1279 = vmatprep.mubr.msk.f32.mxu1 %vm78_vm0, %v37_v0 }
  0x60   :  { %1248 = vmatmul.mubr.msk.f32.gmra.mrb[14].mxu0 %vm78_vm0, %v21_v63  ;;  %1280 = vmatmul.mubr.msk.f32.gmra.mrb[14].mxu1 %vm78_vm0, %v37_v0 }
  0x61   :  { %1249 = vmatprep.mubr.msk.f32.mxu0 %vm78_vm0, %v22_v1  ;;  %1281 = vmatprep.mubr.msk.f32.mxu1 %vm78_vm0, %v38_v2 }
  0x64   :  { %1250 = vmatmul.mubr.msk.f32.gmra.mrb[16].mxu0 %vm78_vm0, %v22_v1  ;;  %1282 = vmatmul.mubr.msk.f32.gmra.mrb[16].mxu1 %vm78_vm0, %v38_v2 }
  0x65   :  { %1251 = vmatprep.mubr.msk.f32.mxu0 %vm78_vm0, %v23_v3  ;;  %1283 = vmatprep.mubr.msk.f32.mxu1 %vm78_vm0, %v39_v4 }
  0x68   :  { %1252 = vmatmul.mubr.msk.f32.gmra.mrb[18].mxu0 %vm78_vm0, %v23_v3  ;;  %1284 = vmatmul.mubr.msk.f32.gmra.mrb[18].mxu1 %vm78_vm0, %v39_v4 }
  0x69   :  { %1253 = vmatprep.mubr.msk.f32.mxu0 %vm78_vm0, %v24_v5  ;;  %1285 = vmatprep.mubr.msk.f32.mxu1 %vm78_vm0, %v40_v6 }
  0x6c   :  { %1254 = vmatmul.mubr.msk.f32.gmra.mrb[20].mxu0 %vm78_vm0, %v24_v5  ;;  %1286 = vmatmul.mubr.msk.f32.gmra.mrb[20].mxu1 %vm78_vm0, %v40_v6 }
  0x6d   :  { %1255 = vmatprep.mubr.msk.f32.mxu0 %vm78_vm0, %v25_v7  ;;  %1287 = vmatprep.mubr.msk.f32.mxu1 %vm78_vm0, %v41_v8 }
  0x70   :  { %1256 = vmatmul.mubr.msk.f32.gmra.mrb[22].mxu0 %vm78_vm0, %v25_v7  ;;  %1288 = vmatmul.mubr.msk.f32.gmra.mrb[22].mxu1 %vm78_vm0, %v41_v8 }
  0x71   :  { %1257 = vmatprep.mubr.msk.f32.mxu0 %vm78_vm0, %v26_v9  ;;  %1289 = vmatprep.mubr.msk.f32.mxu1 %vm78_vm0, %v42_v10 }
  0x74   :  { %1258 = vmatmul.mubr.msk.f32.gmra.mrb[24].mxu0 %vm78_vm0, %v26_v9  ;;  %1290 = vmatmul.mubr.msk.f32.gmra.mrb[24].mxu1 %vm78_vm0, %v42_v10 }
  0x75   :  { %1259 = vmatprep.mubr.msk.f32.mxu0 %vm78_vm0, %v27_v11  ;;  %1291 = vmatprep.mubr.msk.f32.mxu1 %vm78_vm0, %v43_v12 }
  0x78   :  { %1260 = vmatmul.mubr.msk.f32.gmra.mrb[26].mxu0 %vm78_vm0, %v27_v11  ;;  %1292 = vmatmul.mubr.msk.f32.gmra.mrb[26].mxu1 %vm78_vm0, %v43_v12 }
  0x79   :  { %1261 = vmatprep.mubr.msk.f32.mxu0 %vm78_vm0, %v28_v13  ;;  %1293 = vmatprep.mubr.msk.f32.mxu1 %vm78_vm0, %v44_v14 }
  0x7c   :  { %1262 = vmatmul.mubr.msk.f32.gmra.mrb[28].mxu0 %vm78_vm0, %v28_v13  ;;  %1294 = vmatmul.mubr.msk.f32.gmra.mrb[28].mxu1 %vm78_vm0, %v44_v14 }
  0x7d   :  { %1263 = vmatprep.mubr.msk.f32.mxu0 %vm78_vm0, %v29_v15  ;;  %1295 = vmatprep.mubr.msk.f32.mxu1 %vm78_vm0, %v45_v16 }
  0x80   :  { %1264 = vmatmul.mubr.msk.f32.gmra.mrb[30].mxu0 %vm78_vm0, %v29_v15  ;;  %1296 = vmatmul.mubr.msk.f32.gmra.mrb[30].mxu1 %vm78_vm0, %v45_v16 }
 0x117   :  { %v337_v18 = vpop.f32.mrb[0].mxu0  ;;  %v433_v19 = vpop.f32.mrb[0].mxu1 }
 0x118   :  { %v528_v20 = vmul.f32 1.442695, %v337_v18  ;;  %v592_v21 = vmul.f32 1.442695, %v433_v19  ;;  %v339_v22 = vpop.f32.mrb[1].mxu0  ;;  %v435_v23 = vpop.f32.mrb[1].mxu1 }
 0x119   :  { %v530_v24 = vmul.f32 1.442695, %v339_v22  ;;  %v594_v25 = vmul.f32 1.442695, %v435_v23 }
 0x11a   :  { %1364 = vpow2.f32 %v528_v20 }
 0x11b   :  { %1366 = vpow2.f32 %v592_v21  ;;  %v343_v26 = vpop.f32.mrb[2].mxu0  ;;  %v439_v27 = vpop.f32.mrb[2].mxu1 }
 0x11c   :  { %1368 = vpow2.f32 %v530_v24  ;;  %v532_v28 = vmul.f32 1.442695, %v343_v26  ;;  %v596_v29 = vmul.f32 1.442695, %v439_v27  ;;  %v345_v30 = vpop.f32.mrb[3].mxu0  ;;  %v441_v31 = vpop.f32.mrb[3].mxu1 }
 0x11d   :  { %1370 = vpow2.f32 %v594_v25  ;;  %v534_v32 = vmul.f32 1.442695, %v345_v30  ;;  %v598_v33 = vmul.f32 1.442695, %v441_v31 }
 0x11e   :  { %1372 = vpow2.f32 %v532_v28 }
 0x11f   :  { %1374 = vpow2.f32 %v596_v29  ;;  %v349_v34 = vpop.f32.mrb[4].mxu0  ;;  %v445_v35 = vpop.f32.mrb[4].mxu1 }
 0x120   :  { %1376 = vpow2.f32 %v534_v32  ;;  %v536_v36 = vmul.f32 1.442695, %v349_v34  ;;  %v351_v37 = vpop.f32.mrb[5].mxu0  ;;  %v600_v38 = vmul.f32 1.442695, %v445_v35  ;;  %v447_v39 = vpop.f32.mrb[5].mxu1 }
 0x121   :  { %1378 = vpow2.f32 %v598_v33  ;;  %v538_v40 = vmul.f32 1.442695, %v351_v37  ;;  %v602_v41 = vmul.f32 1.442695, %v447_v39 }
 0x122   :  { %1380 = vpow2.f32 %v536_v36 }
 0x123   :  { %1382 = vpow2.f32 %v538_v40  ;;  %v355_v42 = vpop.f32.mrb[6].mxu0  ;;  %v451_v43 = vpop.f32.mrb[6].mxu1 }
 0x124   :  { %v1365_v44 = vpop.eup %1364  ;;  %1384 = vpow2.f32 %v600_v38  ;;  %v540_v45 = vmul.f32 1.442695, %v355_v42  ;;  %v357_v46 = vpop.f32.mrb[7].mxu0  ;;  %v604_v47 = vmul.f32 1.442695, %v451_v43 }
 0x125   :  { %v453_v48 = vpop.f32.mrb[7].mxu1  ;;  %v1969_v49 = vpop.eup %1366  ;;  %1386 = vpow2.f32 %v602_v41  ;;  %v542_v50 = vmul.f32 1.442695, %v357_v46 }
 0x126   :  { %v606_v51 = vmul.f32 1.442695, %v453_v48  ;;  %v1369_v52 = vpop.eup %1368  ;;  %1388 = vpow2.f32 %v540_v45 }
 0x127   :  { %v1971_v53 = vpop.eup %1370  ;;  %1390 = vpow2.f32 %v542_v50  ;;  %v361_v54 = vpop.f32.mrb[8].mxu0  ;;  %v826_v55 = vadd.f32 %v1369_v52, %v1365_v44 }
 0x128   :  { %v457_v56 = vpop.f32.mrb[8].mxu1  ;;  %v1373_v57 = vpop.eup %1372  ;;  %1392 = vpow2.f32 %v604_v47  ;;  %v544_v58 = vmul.f32 1.442695, %v361_v54  ;;  %v874_v62 = vadd.f32 %v1971_v53, %v1969_v49 }
 0x129   :  { %v363_v59 = vpop.f32.mrb[9].mxu0  ;;  %v608_v60 = vmul.f32 1.442695, %v457_v56  ;;  %v459_v61 = vpop.f32.mrb[9].mxu1  ;;  %v656_v0 = vadd.f32 %v1373_v57, %v1365_v44  ;;  %1394 = vpow2.f32 %v606_v51  ;;  %827 = vadd.xlane.f32.xlu0 %v826_v55 }
 0x12a   :  { %v1975_v63 = vpop.eup %1374  ;;  %v546_v1 = vmul.f32 1.442695, %v363_v59  ;;  %v610_v2 = vmul.f32 1.442695, %v459_v61  ;;  %1396 = vpow2.f32 %v544_v58 }
 0x12b   :  { %v1377_v3 = vpop.eup %1376  ;;  %v367_v6 = vpop.f32.mrb[10].mxu0 }
 0x12c   :  { %v1977_v4 = vpop.eup %1378  ;;  %v693_v5 = vadd.f32 %v1377_v3, %v1369_v52  ;;  %1398 = vpow2.f32 %v546_v1  ;;  %v463_v7 = vpop.f32.mrb[10].mxu1  ;;  %v829_v8 = vadd.f32 %v1377_v3, %v1373_v57  ;;  %v548_v10 = vmul.f32 1.442695, %v367_v6 }
 0x12d   :  { %v1381_v9 = vpop.eup %1380  ;;  %1400 = vpow2.f32 %v608_v60  ;;  %v877_v11 = vadd.f32 %v1977_v4, %v1975_v63  ;;  %v369_v12 = vpop.f32.mrb[11].mxu0  ;;  %v612_v13 = vmul.f32 1.442695, %v463_v7  ;;  %875 = vadd.xlane.f32.xlu0 %v874_v62 }
 0x12e   :  { %v465_v14 = vpop.f32.mrb[11].mxu1  ;;  %v1383_v15 = vpop.eup %1382  ;;  %v657_v16 = vadd.f32 %v1381_v9, %v656_v0  ;;  %1402 = vpow2.f32 %v610_v2  ;;  %v550_v17 = vmul.f32 1.442695, %v369_v12 }
 0x12f   :  { %v614_v18 = vmul.f32 1.442695, %v465_v14  ;;  %v1981_v19 = vpop.eup %1384  ;;  %v694_v20 = vadd.f32 %v1383_v15, %v693_v5  ;;  %1404 = vpow2.f32 %v548_v10  ;;  %878 = vadd.xlane.f32.xlu1 %v877_v11  ;;  %v832_v21 = vadd.f32 %v1383_v15, %v1381_v9  ;;  %v373_v23 = vpop.f32.mrb[12].mxu0 }
 0x130   :  { %v1983_v22 = vpop.eup %1386  ;;  %1406 = vpow2.f32 %v550_v17  ;;  %v469_v24 = vpop.f32.mrb[12].mxu1  ;;  %v552_v26 = vmul.f32 1.442695, %v373_v23 }
 0x131   :  { %v1389_v25 = vpop.eup %1388  ;;  %1408 = vpow2.f32 %v612_v13  ;;  %v375_v27 = vpop.f32.mrb[13].mxu0  ;;  %v616_v28 = vmul.f32 1.442695, %v469_v24  ;;  %v880_v30 = vadd.f32 %v1983_v22, %v1981_v19  ;;  %830 = vadd.xlane.f32.xlu0 %v829_v8 }
 0x132   :  { %v471_v29 = vpop.f32.mrb[13].mxu1  ;;  %v1391_v31 = vpop.eup %1390  ;;  %v658_v32 = vadd.f32 %v1389_v25, %v657_v16  ;;  %1410 = vpow2.f32 %v614_v18  ;;  %v554_v33 = vmul.f32 1.442695, %v375_v27 }
 0x133   :  { %v618_v34 = vmul.f32 1.442695, %v471_v29  ;;  %v1987_v35 = vpop.eup %1392  ;;  %v695_v36 = vadd.f32 %v1391_v31, %v694_v20  ;;  %1412 = vpow2.f32 %v552_v26  ;;  %833 = vadd.xlane.f32.xlu1 %v832_v21  ;;  %v835_v37 = vadd.f32 %v1391_v31, %v1389_v25  ;;  %v379_v39 = vpop.f32.mrb[14].mxu0 }
 0x134   :  { %v1989_v38 = vpop.eup %1394  ;;  %1414 = vpow2.f32 %v554_v33  ;;  %v475_v40 = vpop.f32.mrb[14].mxu1  ;;  %v556_v42 = vmul.f32 1.442695, %v379_v39 }
 0x135   :  { %v1397_v41 = vpop.eup %1396  ;;  %1416 = vpow2.f32 %v616_v28  ;;  %v381_v43 = vpop.f32.mrb[15].mxu0  ;;  %v620_v44 = vmul.f32 1.442695, %v475_v40  ;;  %v883_v46 = vadd.f32 %v1989_v38, %v1987_v35  ;;  %881 = vadd.xlane.f32.xlu0 %v880_v30 }
 0x136   :  { %v477_v45 = vpop.f32.mrb[15].mxu1  ;;  %v1399_v47 = vpop.eup %1398  ;;  %v659_v48 = vadd.f32 %v1397_v41, %v658_v32  ;;  %1418 = vpow2.f32 %v618_v34  ;;  %v558_v50 = vmul.f32 1.442695, %v381_v43 }
 0x137   :  { %v622_v51 = vmul.f32 1.442695, %v477_v45  ;;  %v1993_v52 = vpop.eup %1400  ;;  %v696_v54 = vadd.f32 %v1399_v47, %v695_v36  ;;  %1420 = vpow2.f32 %v556_v42  ;;  %836 = vadd.xlane.f32.xlu1 %v835_v37  ;;  %v838_v55 = vadd.f32 %v1399_v47, %v1397_v41  ;;  %v385_v57 = vpop.f32.mrb[16].mxu0 }
 0x138   :  { %v1995_v56 = vpop.eup %1402  ;;  %1422 = vpow2.f32 %v558_v50  ;;  %v481_v58 = vpop.f32.mrb[16].mxu1  ;;  %v560_v60 = vmul.f32 1.442695, %v385_v57 }
 0x139   :  { %v1405_v59 = vpop.eup %1404  ;;  %1424 = vpow2.f32 %v620_v44  ;;  %v387_v61 = vpop.f32.mrb[17].mxu0  ;;  %v624_v62 = vmul.f32 1.442695, %v481_v58  ;;  %v886_v1 = vadd.f32 %v1995_v56, %v1993_v52  ;;  %839 = vadd.xlane.f32.xlu0 %v838_v55 }
 0x13a   :  { %v483_v0 = vpop.f32.mrb[17].mxu1  ;;  %v1407_v2 = vpop.eup %1406  ;;  %v660_v3 = vadd.f32 %v1405_v59, %v659_v48  ;;  %1426 = vpow2.f32 %v622_v51  ;;  %v562_v5 = vmul.f32 1.442695, %v387_v61 }
 0x13b   :  { %v626_v6 = vmul.f32 1.442695, %v483_v0  ;;  %v1999_v7 = vpop.eup %1408  ;;  %v697_v8 = vadd.f32 %v1407_v2, %v696_v54  ;;  %1428 = vpow2.f32 %v560_v60  ;;  %884 = vadd.xlane.f32.xlu1 %v883_v46  ;;  %v841_v9 = vadd.f32 %v1407_v2, %v1405_v59  ;;  %v391_v11 = vpop.f32.mrb[18].mxu0 }
 0x13c   :  { %v2001_v10 = vpop.eup %1410  ;;  %1430 = vpow2.f32 %v562_v5  ;;  %v487_v12 = vpop.f32.mrb[18].mxu1  ;;  %v564_v14 = vmul.f32 1.442695, %v391_v11 }
 0x13d   :  { %v1413_v13 = vpop.eup %1412  ;;  %1432 = vpow2.f32 %v624_v62  ;;  %v393_v15 = vpop.f32.mrb[19].mxu0  ;;  %v628_v16 = vmul.f32 1.442695, %v487_v12  ;;  %v889_v18 = vadd.f32 %v2001_v10, %v1999_v7  ;;  %887 = vadd.xlane.f32.xlu0 %v886_v1 }
 0x13e   :  { %v489_v17 = vpop.f32.mrb[19].mxu1  ;;  %v1415_v20 = vpop.eup %1414  ;;  %v661_v21 = vadd.f32 %v1413_v13, %v660_v3  ;;  %1434 = vpow2.f32 %v626_v6  ;;  %v566_v23 = vmul.f32 1.442695, %v393_v15 }
 0x13f   :  { %v630_v24 = vmul.f32 1.442695, %v489_v17  ;;  %v2005_v25 = vpop.eup %1416  ;;  %v698_v26 = vadd.f32 %v1415_v20, %v697_v8  ;;  %1436 = vpow2.f32 %v564_v14  ;;  %842 = vadd.xlane.f32.xlu1 %v841_v9  ;;  %v844_v27 = vadd.f32 %v1415_v20, %v1413_v13  ;;  %v397_v29 = vpop.f32.mrb[20].mxu0 }
 0x140   :  { %v2007_v28 = vpop.eup %1418  ;;  %1438 = vpow2.f32 %v566_v23  ;;  %v493_v30 = vpop.f32.mrb[20].mxu1  ;;  %v568_v32 = vmul.f32 1.442695, %v397_v29 }
 0x141   :  { %v1421_v31 = vpop.eup %1420  ;;  %1440 = vpow2.f32 %v628_v16  ;;  %v399_v33 = vpop.f32.mrb[21].mxu0  ;;  %v632_v34 = vmul.f32 1.442695, %v493_v30  ;;  %v892_v37 = vadd.f32 %v2007_v28, %v2005_v25  ;;  %845 = vadd.xlane.f32.xlu0 %v844_v27 }
 0x142   :  { %v495_v36 = vpop.f32.mrb[21].mxu1  ;;  %v1423_v39 = vpop.eup %1422  ;;  %v662_v40 = vadd.f32 %v1421_v31, %v661_v21  ;;  %1442 = vpow2.f32 %v630_v24  ;;  %v570_v41 = vmul.f32 1.442695, %v399_v33 }
 0x143   :  { %v634_v42 = vmul.f32 1.442695, %v495_v36  ;;  %v2011_v43 = vpop.eup %1424  ;;  %v699_v44 = vadd.f32 %v1423_v39, %v698_v26  ;;  %1444 = vpow2.f32 %v568_v32  ;;  %890 = vadd.xlane.f32.xlu1 %v889_v18  ;;  %v847_v45 = vadd.f32 %v1423_v39, %v1421_v31  ;;  %v403_v47 = vpop.f32.mrb[22].mxu0 }
 0x144   :  { %v2013_v46 = vpop.eup %1426  ;;  %1446 = vpow2.f32 %v570_v41  ;;  %v499_v48 = vpop.f32.mrb[22].mxu1  ;;  %v572_v51 = vmul.f32 1.442695, %v403_v47 }
 0x145   :  { %v1429_v50 = vpop.eup %1428  ;;  %1448 = vpow2.f32 %v632_v34  ;;  %v405_v54 = vpop.f32.mrb[23].mxu0  ;;  %v636_v55 = vmul.f32 1.442695, %v499_v48  ;;  %v895_v58 = vadd.f32 %v2013_v46, %v2011_v43  ;;  %893 = vadd.xlane.f32.xlu0 %v892_v37 }
 0x146   :  { %v501_v57 = vpop.f32.mrb[23].mxu1  ;;  %v1431_v59 = vpop.eup %1430  ;;  %v663_v60 = vadd.f32 %v1429_v50, %v662_v40  ;;  %1450 = vpow2.f32 %v634_v42  ;;  %v574_v61 = vmul.f32 1.442695, %v405_v54 }
 0x147   :  { %v638_v62 = vmul.f32 1.442695, %v501_v57  ;;  %v2017_v0 = vpop.eup %1432  ;;  %v700_v1 = vadd.f32 %v1431_v59, %v699_v44  ;;  %1452 = vpow2.f32 %v572_v51  ;;  %848 = vadd.xlane.f32.xlu1 %v847_v45  ;;  %v850_v2 = vadd.f32 %v1431_v59, %v1429_v50  ;;  %v409_v5 = vpop.f32.mrb[24].mxu0 }
 0x148   :  { %v2019_v3 = vpop.eup %1434  ;;  %1454 = vpow2.f32 %v574_v61  ;;  %v505_v6 = vpop.f32.mrb[24].mxu1  ;;  %v576_v9 = vmul.f32 1.442695, %v409_v5 }
 0x149   :  { %v1437_v8 = vpop.eup %1436  ;;  %1456 = vpow2.f32 %v636_v55  ;;  %v411_v11 = vpop.f32.mrb[25].mxu0  ;;  %v640_v12 = vmul.f32 1.442695, %v505_v6  ;;  %v898_v14 = vadd.f32 %v2019_v3, %v2017_v0  ;;  %851 = vadd.xlane.f32.xlu0 %v850_v2 }
 0x14a   :  { %v507_v13 = vpop.f32.mrb[25].mxu1  ;;  %v1439_v15 = vpop.eup %1438  ;;  %v664_v16 = vadd.f32 %v1437_v8, %v663_v60  ;;  %1458 = vpow2.f32 %v638_v62  ;;  %v578_v17 = vmul.f32 1.442695, %v411_v11 }
 0x14b   :  { %v642_v18 = vmul.f32 1.442695, %v507_v13  ;;  %v2023_v20 = vpop.eup %1440  ;;  %v701_v21 = vadd.f32 %v1439_v15, %v700_v1  ;;  %1460 = vpow2.f32 %v576_v9  ;;  %896 = vadd.xlane.f32.xlu1 %v895_v58  ;;  %v853_v23 = vadd.f32 %v1439_v15, %v1437_v8  ;;  %v415_v26 = vpop.f32.mrb[26].mxu0 }
 0x14c   :  { %v2025_v24 = vpop.eup %1442  ;;  %1462 = vpow2.f32 %v578_v17  ;;  %v511_v27 = vpop.f32.mrb[26].mxu1  ;;  %v580_v30 = vmul.f32 1.442695, %v415_v26 }
 0x14d   :  { %v1445_v29 = vpop.eup %1444  ;;  %1464 = vpow2.f32 %v640_v12  ;;  %v417_v31 = vpop.f32.mrb[27].mxu0  ;;  %v644_v32 = vmul.f32 1.442695, %v511_v27  ;;  %v901_v34 = vadd.f32 %v2025_v24, %v2023_v20  ;;  %899 = vadd.xlane.f32.xlu0 %v898_v14 }
 0x14e   :  { %v513_v33 = vpop.f32.mrb[27].mxu1  ;;  %v1447_v36 = vpop.eup %1446  ;;  %v665_v37 = vadd.f32 %v1445_v29, %v664_v16  ;;  %1466 = vpow2.f32 %v642_v18  ;;  %v582_v39 = vmul.f32 1.442695, %v417_v31 }
 0x14f   :  { %v646_v40 = vmul.f32 1.442695, %v513_v33  ;;  %v2029_v41 = vpop.eup %1448  ;;  %v702_v42 = vadd.f32 %v1447_v36, %v701_v21  ;;  %1468 = vpow2.f32 %v580_v30  ;;  %854 = vadd.xlane.f32.xlu1 %v853_v23  ;;  %v856_v44 = vadd.f32 %v1447_v36, %v1445_v29  ;;  %v421_v47 = vpop.f32.mrb[28].mxu0 }
 0x150   :  { %v2031_v45 = vpop.eup %1450  ;;  %1470 = vpow2.f32 %v582_v39  ;;  %v517_v48 = vpop.f32.mrb[28].mxu1  ;;  %v584_v51 = vmul.f32 1.442695, %v421_v47 }
 0x151   :  { %v1453_v50 = vpop.eup %1452  ;;  %1472 = vpow2.f32 %v644_v32  ;;  %v423_v54 = vpop.f32.mrb[29].mxu0  ;;  %v648_v55 = vmul.f32 1.442695, %v517_v48  ;;  %v904_v58 = vadd.f32 %v2031_v45, %v2029_v41  ;;  %857 = vadd.xlane.f32.xlu0 %v856_v44 }
 0x152   :  { %v519_v57 = vpop.f32.mrb[29].mxu1  ;;  %v1455_v59 = vpop.eup %1454  ;;  %v666_v60 = vadd.f32 %v1453_v50, %v665_v37  ;;  %1474 = vpow2.f32 %v646_v40  ;;  %v586_v61 = vmul.f32 1.442695, %v423_v54 }
 0x153   :  { %v650_v62 = vmul.f32 1.442695, %v519_v57  ;;  %v2035_v1 = vpop.eup %1456  ;;  %v703_v2 = vadd.f32 %v1455_v59, %v702_v42  ;;  %1476 = vpow2.f32 %v584_v51  ;;  %902 = vadd.xlane.f32.xlu1 %v901_v34  ;;  %v859_v5 = vadd.f32 %v1455_v59, %v1453_v50  ;;  %v427_v8 = vpop.f32.mrb[30].mxu0 }
 0x154   :  { %v2037_v6 = vpop.eup %1458  ;;  %1478 = vpow2.f32 %v586_v61  ;;  %v523_v9 = vpop.f32.mrb[30].mxu1  ;;  %v588_v12 = vmul.f32 1.442695, %v427_v8 }
 0x155   :  { %v1461_v11 = vpop.eup %1460  ;;  %1480 = vpow2.f32 %v648_v55  ;;  %v429_v13 = vpop.f32.mrb[31].mxu0  ;;  %v652_v14 = vmul.f32 1.442695, %v523_v9  ;;  %v907_v16 = vadd.f32 %v2037_v6, %v2035_v1  ;;  %905 = vadd.xlane.f32.xlu0 %v904_v58 }
 0x156   :  { %v525_v15 = vpop.f32.mrb[31].mxu1  ;;  %v1463_v17 = vpop.eup %1462  ;;  %v667_v18 = vadd.f32 %v1461_v11, %v666_v60  ;;  %1482 = vpow2.f32 %v650_v62  ;;  %v590_v21 = vmul.f32 1.442695, %v429_v13 }
 0x157   :  { %v654_v23 = vmul.f32 1.442695, %v525_v15  ;;  %v2041_v26 = vpop.eup %1464  ;;  %v704_v27 = vadd.f32 %v1463_v17, %v703_v2  ;;  %1484 = vpow2.f32 %v588_v12  ;;  %860 = vadd.xlane.f32.xlu1 %v859_v5  ;;  %v862_v29 = vadd.f32 %v1463_v17, %v1461_v11 }
 0x158   :  { %v2043_v30 = vpop.eup %1466  ;;  %1486 = vpow2.f32 %v590_v21 }
 0x159   :  { %v1469_v31 = vpop.eup %1468  ;;  %1488 = vpow2.f32 %v652_v14  ;;  %v910_v32 = vadd.f32 %v2043_v30, %v2041_v26  ;;  %863 = vadd.xlane.f32.xlu0 %v862_v29 }
 0x15a   :  { %v1471_v33 = vpop.eup %1470  ;;  %v668_v34 = vadd.f32 %v1469_v31, %v667_v18  ;;  %1490 = vpow2.f32 %v654_v23 }
 0x15b   :  { %v1473_v36 = vpop.eup %1472  ;;  %v705_v37 = vadd.f32 %v1471_v33, %v704_v27  ;;  %908 = vadd.xlane.f32.xlu1 %v907_v16  ;;  %v865_v39 = vadd.f32 %v1471_v33, %v1469_v31  ;;  %v1581_v33 = vmov 1966171168  }
 0x15c   :  { %v1475_v40 = vpop.eup %1474 }
 0x15d   :  { %v1477_v42 = vpop.eup %1476  ;;  %v913_v44 = vadd.f32 %v1475_v40, %v1473_v36  ;;  %911 = vadd.xlane.f32.xlu0 %v910_v32 }
 0x15e   :  { %v1479_v47 = vpop.eup %1478  ;;  %v669_v48 = vadd.f32 %v1477_v42, %v668_v34  ;;  %v737_v34 = vlaneseq }
 0x15f   :  { %v1481_v50 = vpop.eup %1480  ;;  %v706_v51 = vadd.f32 %v1479_v47, %v705_v37  ;;  %866 = vadd.xlane.f32.xlu1 %v865_v39  ;;  %v868_v54 = vadd.f32 %v1479_v47, %v1477_v42 }
 0x160   :  { %v1483_v55 = vpop.eup %1482  ;;  %v738_v42 = vshrl.u32 %v737_v34, 7  ;;  %vm754_vm3 = vcmp.lt.s32.totalorder %v737_v34, 256 }
 0x161   :  { %v1485_v57 = vpop.eup %1484  ;;  %v916_v58 = vadd.f32 %v1483_v55, %v1481_v50  ;;  %869 = vadd.xlane.f32.xlu0 %v868_v54 }
 0x162   :  { %v1487_v59 = vpop.eup %1486  ;;  %v670_v60 = vadd.f32 %v1485_v57, %v669_v48 }
 0x163   :  { %v1489_v61 = vpop.eup %1488  ;;  %v707_v62 = vadd.f32 %v1487_v59, %v706_v51  ;;  %914 = vadd.xlane.f32.xlu1 %v913_v44  ;;  %v871_v2 = vadd.f32 %v1487_v59, %v1485_v57 }
 0x164   :  { %v1491_v5 = vpop.eup %1490  ;;  %v671_v8 = vadd.f32 %v1969_v49, %v670_v60 }
 0x165   :  { %v708_v9 = vadd.f32 %v1971_v53, %v707_v62  ;;  %v919_v11 = vadd.f32 %v1491_v5, %v1489_v61  ;;  %917 = vadd.xlane.f32.xlu0 %v916_v58 }
 0x166   :  { %v672_v12 = vadd.f32 %v1975_v63, %v671_v8 }
 0x167   :  { %v709_v13 = vadd.f32 %v1977_v4, %v708_v9  ;;  %872 = vadd.xlane.f32.xlu1 %v871_v2 }
 0x168   :  { %v673_v14 = vadd.f32 %v1981_v19, %v672_v12 }
 0x169   :  { %v710_v15 = vadd.f32 %v1983_v22, %v709_v13 }
 0x16a   :  { %v674_v16 = vadd.f32 %v1987_v35, %v673_v14 }
 0x16b   :  { %v711_v17 = vadd.f32 %v1989_v38, %v710_v15  ;;  %920 = vadd.xlane.f32.xlu1 %v919_v11 }
 0x16c   :  { %v675_v49 = vadd.f32 %v1993_v52, %v674_v16 }
 0x16d   :  { %v712_v53 = vadd.f32 %v1995_v56, %v711_v17 }
 0x16e   :  { %v676_v18 = vadd.f32 %v1999_v7, %v675_v49 }
 0x16f   :  { %v713_v63 = vadd.f32 %v2001_v10, %v712_v53 }
 0x170   :  { %v677_v4 = vadd.f32 %v2005_v25, %v676_v18 }
 0x171   :  { %v714_v21 = vadd.f32 %v2007_v28, %v713_v63 }
 0x172   :  { %v678_v19 = vadd.f32 %v2011_v43, %v677_v4 }
 0x173   :  { %v715_v22 = vadd.f32 %v2013_v46, %v714_v21 }
 0x174   :  { %v679_v35 = vadd.f32 %v2017_v0, %v678_v19 }
 0x175   :  { %v716_v38 = vadd.f32 %v2019_v3, %v715_v22 }
 0x176   :  { %v680_v52 = vadd.f32 %v2023_v20, %v679_v35 }
 0x177   :  { %v717_v56 = vadd.f32 %v2025_v24, %v716_v38 }
 0x178   :  { %v681_v7 = vadd.f32 %v2029_v41, %v680_v52 }
 0x179   :  { %v718_v10 = vadd.f32 %v2031_v45, %v717_v56  ;;  %v735_v45 = vunpack.c.l.s4 %v1581_v33 }
 0x17a   :  { %v682_v25 = vadd.f32 %v2035_v1, %v681_v7 }
 0x17b   :  { %v719_v28 = vadd.f32 %v2037_v6, %v718_v10 }
 0x17c   :  { %v683_v43 = vadd.f32 %v2041_v26, %v682_v25  ;;  %v736_v26 = vunpack.c.0.s8 %v735_v45 }
 0x17d   :  { %v720_v46 = vadd.f32 %v2043_v30, %v719_v28 }
 0x17e   :  { %v684_v23 = vadd.f32 %v1473_v36, %v683_v43  ;;  %v739_v47 = vsub.s32 %v736_v26, %v738_v42 }
 0x17f   :  { %v721_v0 = vadd.f32 %v1475_v40, %v720_v46 }
 0x180   :  { %v685_v27 = vadd.f32 %v1481_v50, %v684_v23 }
 0x181   :  { %v722_v3 = vadd.f32 %v1483_v55, %v721_v0 }
 0x182   :  { %v686_v29 = vadd.f32 %v1489_v61, %v685_v27 }
 0x183   :  { %v723_v20 = vadd.f32 %v1491_v5, %v722_v3 }
 0x184   :  { %v687_v31 = vrot.slane %v686_v29, 4 }
 0x185   :  { %v724_v24 = vrot.slane %v723_v20, 4 }
 0x186   :  { %v688_v32 = vadd.f32 %v687_v31, %v686_v29 }
 0x187   :  { %v725_v41 = vadd.f32 %v724_v24, %v723_v20 }
 0x188   :  { %v689_v1 = vrot.slane %v688_v32, 2 }
 0x189   :  { %v726_v37 = vrot.slane %v725_v41, 2 }
 0x18a   :  { %v690_v6 = vadd.f32 %v689_v1, %v688_v32 }
 0x18b   :  { %v727_v39 = vadd.f32 %v726_v37, %v725_v41 }
 0x18c   :  { %v691_v30 = vrot.slane %v690_v6, 1 }
 0x18d   :  { %v728_v36 = vrot.slane %v727_v39, 1 }
 0x18e   :  { %v692_v40 = vadd.f32 %v691_v30, %v690_v6 }
 0x18f   :  { %v729_v44 = vadd.f32 %v728_v36, %v727_v39 }
 0x191   :  { %v733_v48 = vcombine.low %v692_v40, %v729_v44 }
 0x193   :  { %v740_v50 = vrot.slane %v733_v48, %v739_v47 }
 0x195   :  { %v747_v51 = vrot.slane %v740_v50, %v739_v47 }
 0x197   :  { %756 = vst.msk [vmem:[#allocation3] sm:$0x3] %vm754_vm3, %v747_v51 }
 0x198   :  { %1567 = shalt.err (!%p1564_p4)
}
 0x199   :  { %s1568_s6 = scalar_lea.hbm %s2247_s2, 32 }
 0x19a   :  { %p1569_p5 = scmp.ne.s32.totalorder %s2247_s2, %s1568_s6  ;;  %p1572_p6 = scmp.lt.u32.totalorder %s1568_s6, %s2247_s2 }
 0x19c   :  { %p1574_p7 = pnand %p1572_p6, %p1569_p5 }
 0x19e   :  { %1577 = shalt.err (!%p1574_p7)
}
 0x19f   :  { %1127 = dma.vmem_to_hbm [thread:$0]  %s1125_s1, 32, %s2247_s2, [#allocation4]   ;;  %v794_v54 = vld [vmem:[#allocation2] sm:$0xff]  ;;  %v811_v59 = vld [vmem:[#allocation2 + $0x88] sm:$0xff]  ;;  %v796_v8 = vld [vmem:[#allocation2 + $0x10] sm:$0xff] }
 0x1a0   :  { %v810_v58 = vld [vmem:[#allocation2 + $0x80] sm:$0xff]  ;;  %v795_v5 = vld [vmem:[#allocation2 + $0x8] sm:$0xff]  ;;  %v812_v15 = vld [vmem:[#allocation2 + $0x90] sm:$0xff] }
 0x1a1   :  { %v797_v16 = vld [vmem:[#allocation2 + $0x18] sm:$0xff]  ;;  %v798_v4 = vld [vmem:[#allocation2 + $0x20] sm:$0xff]  ;;  %v799_v25 = vld [vmem:[#allocation2 + $0x28] sm:$0xff] }
 0x1a2   :  { %v813_v19 = vld [vmem:[#allocation2 + $0x98] sm:$0xff]  ;;  %v814_v7 = vld [vmem:[#allocation2 + $0xa0] sm:$0xff]  ;;  %v800_v29 = vld [vmem:[#allocation2 + $0x30] sm:$0xff] }
 0x1a3   :  { %v815_v31 = vld [vmem:[#allocation2 + $0xa8] sm:$0xff]  ;;  %v816_v6 = vld [vmem:[#allocation2 + $0xb0] sm:$0xff]  ;;  %v801_v42 = vld [vmem:[#allocation2 + $0x38] sm:$0xff] }
 0x1b6   :  { %v828_v55 = vpop.xlane.xlu0 %827 }
 0x1b7   :  { %v922_v57 = vadd.f32 %v828_v55, %v794_v54  ;;  %v802_v54 = vld [vmem:[#allocation2 + $0x40] sm:$0xff] }
 0x1b9   :  { %955 = vst.msk [vmem:[#allocation2] sm:$0xff] %vm761_vm2, %v922_v57 }
 0x1ba   :  { %v876_v60 = vpop.xlane.xlu0 %875 }
 0x1bb   :  { %v938_v62 = vadd.f32 %v876_v60, %v810_v58  ;;  %v817_v58 = vld [vmem:[#allocation2 + $0xb8] sm:$0xff] }
 0x1bc   :  { %v879_v61 = vpop.xlane.xlu1 %878 }
 0x1bd   :  { %v939_v2 = vadd.f32 %v879_v61, %v811_v59  ;;  %971 = vst.msk [vmem:[#allocation2 + $0x80] sm:$0xff] %vm761_vm2, %v938_v62 }
 0x1be   :  { %v831_v9 = vpop.xlane.xlu0 %830 }
 0x1bf   :  { %972 = vst.msk [vmem:[#allocation2 + $0x88] sm:$0xff] %vm761_vm2, %v939_v2  ;;  %v923_v11 = vadd.f32 %v831_v9, %v795_v5 }
 0x1c0   :  { %v834_v12 = vpop.xlane.xlu1 %833  ;;  %v990_v13 = vld [vmem:[#allocation2] sm:$0xff] }
 0x1c1   :  { %v924_v14 = vadd.f32 %v834_v12, %v796_v8  ;;  %1492 = vlog2.f32 %v990_v13  ;;  %956 = vst.msk [vmem:[#allocation2 + $0x8] sm:$0xff] %vm761_vm2, %v923_v11  ;;  %v818_v11 = vld [vmem:[#allocation2 + $0xc0] sm:$0xff] }
 0x1c2   :  { %v882_v17 = vpop.xlane.xlu0 %881 }
 0x1c3   :  { %957 = vst.msk [vmem:[#allocation2 + $0x10] sm:$0xff] %vm761_vm2, %v924_v14  ;;  %v940_v49 = vadd.f32 %v882_v17, %v812_v15  ;;  %v803_v14 = vld [vmem:[#allocation2 + $0x48] sm:$0xff] }
 0x1c4   :  { %v837_v53 = vpop.xlane.xlu1 %836  ;;  %v1006_v18 = vld [vmem:[#allocation2 + $0x80] sm:$0xff] }
 0x1c5   :  { %v925_v63 = vadd.f32 %v837_v53, %v797_v16  ;;  %1494 = vlog2.f32 %v1006_v18  ;;  %973 = vst.msk [vmem:[#allocation2 + $0x90] sm:$0xff] %vm761_vm2, %v940_v49 }
 0x1c6   :  { %v1007_v21 = vld [vmem:[#allocation2 + $0x88] sm:$0xff]  ;;  %v840_v22 = vpop.xlane.xlu0 %839 }
 0x1c7   :  { %1496 = vlog2.f32 %v1007_v21  ;;  %958 = vst.msk [vmem:[#allocation2 + $0x18] sm:$0xff] %vm761_vm2, %v925_v63  ;;  %v926_v38 = vadd.f32 %v840_v22, %v798_v4  ;;  %v804_v21 = vld [vmem:[#allocation2 + $0x50] sm:$0xff] }
 0x1c8   :  { %v885_v35 = vpop.xlane.xlu1 %884  ;;  %v991_v52 = vld [vmem:[#allocation2 + $0x8] sm:$0xff] }
 0x1c9   :  { %v941_v56 = vadd.f32 %v885_v35, %v813_v19  ;;  %1498 = vlog2.f32 %v991_v52  ;;  %959 = vst.msk [vmem:[#allocation2 + $0x20] sm:$0xff] %vm761_vm2, %v926_v38  ;;  %v819_v35 = vld [vmem:[#allocation2 + $0xc8] sm:$0xff] }
 0x1ca   :  { %v992_v10 = vld [vmem:[#allocation2 + $0x10] sm:$0xff]  ;;  %v888_v28 = vpop.xlane.xlu0 %887 }
 0x1cb   :  { %1500 = vlog2.f32 %v992_v10  ;;  %974 = vst.msk [vmem:[#allocation2 + $0x98] sm:$0xff] %vm761_vm2, %v941_v56  ;;  %v1493_v43 = vpop.eup %1492  ;;  %v942_v46 = vadd.f32 %v888_v28, %v814_v7 }
 0x1cc   :  { %v843_v23 = vpop.xlane.xlu1 %842  ;;  %v1023_v0 = vmul.f32 0.6931472, %v1493_v43  ;;  %v1008_v27 = vld [vmem:[#allocation2 + $0x90] sm:$0xff] }
 0x1cd   :  { %v927_v3 = vadd.f32 %v843_v23, %v799_v25  ;;  %1502 = vlog2.f32 %v1008_v27  ;;  %975 = vst.msk [vmem:[#allocation2 + $0xa0] sm:$0xff] %vm761_vm2, %v942_v46  ;;  %v820_v46 = vld [vmem:[#allocation2 + $0xd0] sm:$0xff]  ;;  %v805_v27 = vld [vmem:[#allocation2 + $0x58] sm:$0xff] }
 0x1ce   :  { %v993_v20 = vld [vmem:[#allocation2 + $0x18] sm:$0xff]  ;;  %1086 = vst.msk [vmem:[%s2248_s3] sm:$0xff] %vm761_vm2, %v1023_v0  ;;  %v846_v24 = vpop.xlane.xlu0 %845 }
 0x1cf   :  { %1504 = vlog2.f32 %v993_v20  ;;  %960 = vst.msk [vmem:[#allocation2 + $0x28] sm:$0xff] %vm761_vm2, %v927_v3  ;;  %v1495_v32 = vpop.eup %1494  ;;  %v928_v33 = vadd.f32 %v846_v24, %v800_v29 }
 0x1d0   :  { %v891_v41 = vpop.xlane.xlu1 %890  ;;  %v1055_v34 = vmul.f32 0.6931472, %v1495_v32  ;;  %v994_v1 = vld [vmem:[#allocation2 + $0x20] sm:$0xff] }
 0x1d1   :  { %v1497_v45 = vpop.eup %1496  ;;  %v943_v37 = vadd.f32 %v891_v41, %v815_v31  ;;  %1506 = vlog2.f32 %v994_v1  ;;  %961 = vst.msk [vmem:[#allocation2 + $0x30] sm:$0xff] %vm761_vm2, %v928_v33 }
 0x1d2   :  { %v1057_v39 = vmul.f32 0.6931472, %v1497_v45  ;;  %v1009_v26 = vld [vmem:[#allocation2 + $0x98] sm:$0xff]  ;;  %1102 = vst.msk [vmem:[%s2248_s3 + $0x80] sm:$0xff] %vm761_vm2, %v1055_v34  ;;  %v894_v30 = vpop.xlane.xlu0 %893  ;;  %v806_v45 = vld [vmem:[#allocation2 + $0x60] sm:$0xff] }
 0x1d3   :  { %1508 = vlog2.f32 %v1009_v26  ;;  %976 = vst.msk [vmem:[#allocation2 + $0xa8] sm:$0xff] %vm761_vm2, %v943_v37  ;;  %v1499_v36 = vpop.eup %1498  ;;  %v944_v40 = vadd.f32 %v894_v30, %v816_v6  ;;  %v821_v37 = vld [vmem:[#allocation2 + $0xd8] sm:$0xff] }
 0x1d4   :  { %1103 = vst.msk [vmem:[%s2248_s3 + $0x88] sm:$0xff] %vm761_vm2, %v1057_v39  ;;  %v849_v44 = vpop.xlane.xlu1 %848  ;;  %v1025_v48 = vmul.f32 0.6931472, %v1499_v36  ;;  %v1010_v50 = vld [vmem:[#allocation2 + $0xa0] sm:$0xff] }
 0x1d5   :  { %v1501_v47 = vpop.eup %1500  ;;  %v929_v51 = vadd.f32 %v849_v44, %v801_v42  ;;  %1510 = vlog2.f32 %v1010_v50  ;;  %977 = vst.msk [vmem:[#allocation2 + $0xb0] sm:$0xff] %vm761_vm2, %v944_v40 }
 0x1d6   :  { %v1027_v55 = vmul.f32 0.6931472, %v1501_v47  ;;  %v995_v57 = vld [vmem:[#allocation2 + $0x28] sm:$0xff]  ;;  %1087 = vst.msk [vmem:[%s2248_s3 + $0x8] sm:$0xff] %vm761_vm2, %v1025_v48  ;;  %v852_v59 = vpop.xlane.xlu0 %851  ;;  %v822_v47 = vld [vmem:[#allocation2 + $0xe0] sm:$0xff] }
 0x1d7   :  { %1512 = vlog2.f32 %v995_v57  ;;  %962 = vst.msk [vmem:[#allocation2 + $0x38] sm:$0xff] %vm761_vm2, %v929_v51  ;;  %v1503_v60 = vpop.eup %1502  ;;  %v930_v62 = vadd.f32 %v852_v59, %v802_v54  ;;  %v807_v51 = vld [vmem:[#allocation2 + $0x68] sm:$0xff] }
 0x1d8   :  { %1088 = vst.msk [vmem:[%s2248_s3 + $0x10] sm:$0xff] %vm761_vm2, %v1027_v55  ;;  %v897_v61 = vpop.xlane.xlu1 %896  ;;  %v1059_v5 = vmul.f32 0.6931472, %v1503_v60  ;;  %v996_v8 = vld [vmem:[#allocation2 + $0x30] sm:$0xff] }
 0x1d9   :  { %v1505_v2 = vpop.eup %1504  ;;  %v945_v9 = vadd.f32 %v897_v61, %v817_v58  ;;  %1514 = vlog2.f32 %v996_v8  ;;  %963 = vst.msk [vmem:[#allocation2 + $0x40] sm:$0xff] %vm761_vm2, %v930_v62 }
 0x1da   :  { %v1029_v12 = vmul.f32 0.6931472, %v1505_v2  ;;  %v1011_v13 = vld [vmem:[#allocation2 + $0xa8] sm:$0xff]  ;;  %1104 = vst.msk [vmem:[%s2248_s3 + $0x90] sm:$0xff] %vm761_vm2, %v1059_v5  ;;  %v900_v15 = vpop.xlane.xlu0 %899  ;;  %v808_v2 = vld [vmem:[#allocation2 + $0x70] sm:$0xff] }
 0x1db   :  { %1516 = vlog2.f32 %v1011_v13  ;;  %978 = vst.msk [vmem:[#allocation2 + $0xb8] sm:$0xff] %vm761_vm2, %v945_v9  ;;  %v1507_v16 = vpop.eup %1506  ;;  %v946_v17 = vadd.f32 %v900_v15, %v818_v11  ;;  %v823_v9 = vld [vmem:[#allocation2 + $0xe8] sm:$0xff] }
 0x1dc   :  { %1089 = vst.msk [vmem:[%s2248_s3 + $0x18] sm:$0xff] %vm761_vm2, %v1029_v12  ;;  %v855_v49 = vpop.xlane.xlu1 %854  ;;  %v1031_v18 = vmul.f32 0.6931472, %v1507_v16  ;;  %v1012_v63 = vld [vmem:[#allocation2 + $0xb0] sm:$0xff] }
 0x1dd   :  { %v1509_v53 = vpop.eup %1508  ;;  %v931_v4 = vadd.f32 %v855_v49, %v803_v14  ;;  %1518 = vlog2.f32 %v1012_v63  ;;  %979 = vst.msk [vmem:[#allocation2 + $0xc0] sm:$0xff] %vm761_vm2, %v946_v17 }
 0x1de   :  { %v1061_v19 = vmul.f32 0.6931472, %v1509_v53  ;;  %v997_v22 = vld [vmem:[#allocation2 + $0x38] sm:$0xff]  ;;  %1090 = vst.msk [vmem:[%s2248_s3 + $0x20] sm:$0xff] %vm761_vm2, %v1031_v18  ;;  %v858_v38 = vpop.xlane.xlu0 %857  ;;  %v824_v53 = vld [vmem:[#allocation2 + $0xf0] sm:$0xff] }
 0x1df   :  { %1520 = vlog2.f32 %v997_v22  ;;  %964 = vst.msk [vmem:[#allocation2 + $0x48] sm:$0xff] %vm761_vm2, %v931_v4  ;;  %v1511_v52 = vpop.eup %1510  ;;  %v932_v7 = vadd.f32 %v858_v38, %v804_v21  ;;  %v809_v4 = vld [vmem:[#allocation2 + $0x78] sm:$0xff] }
 0x1e0   :  { %1105 = vst.msk [vmem:[%s2248_s3 + $0x98] sm:$0xff] %vm761_vm2, %v1061_v19  ;;  %v903_v56 = vpop.xlane.xlu1 %902  ;;  %v1063_v25 = vmul.f32 0.6931472, %v1511_v52  ;;  %v998_v28 = vld [vmem:[#allocation2 + $0x40] sm:$0xff] }
 0x1e1   :  { %v1513_v10 = vpop.eup %1512  ;;  %v947_v43 = vadd.f32 %v903_v56, %v819_v35  ;;  %1522 = vlog2.f32 %v998_v28  ;;  %965 = vst.msk [vmem:[#allocation2 + $0x50] sm:$0xff] %vm761_vm2, %v932_v7  ;;  %v825_v28 = vld [vmem:[#allocation2 + $0xf8] sm:$0xff] }
 0x1e2   :  { %v1033_v23 = vmul.f32 0.6931472, %v1513_v10  ;;  %v1013_v0 = vld [vmem:[#allocation2 + $0xb8] sm:$0xff]  ;;  %1106 = vst.msk [vmem:[%s2248_s3 + $0xa0] sm:$0xff] %vm761_vm2, %v1063_v25  ;;  %v906_v3 = vpop.xlane.xlu0 %905 }
 0x1e3   :  { %1524 = vlog2.f32 %v1013_v0  ;;  %980 = vst.msk [vmem:[#allocation2 + $0xc8] sm:$0xff] %vm761_vm2, %v947_v43  ;;  %v1515_v29 = vpop.eup %1514  ;;  %v948_v20 = vadd.f32 %v906_v3, %v820_v46 }
 0x1e4   :  { %1091 = vst.msk [vmem:[%s2248_s3 + $0x28] sm:$0xff] %vm761_vm2, %v1033_v23  ;;  %v861_v31 = vpop.xlane.xlu1 %860  ;;  %v1035_v32 = vmul.f32 0.6931472, %v1515_v29  ;;  %v1014_v41 = vld [vmem:[#allocation2 + $0xc0] sm:$0xff] }
 0x1e5   :  { %v1517_v24 = vpop.eup %1516  ;;  %v933_v33 = vadd.f32 %v861_v31, %v805_v27  ;;  %1526 = vlog2.f32 %v1014_v41  ;;  %981 = vst.msk [vmem:[#allocation2 + $0xd0] sm:$0xff] %vm761_vm2, %v948_v20 }
 0x1e6   :  { %v1065_v34 = vmul.f32 0.6931472, %v1517_v24  ;;  %v999_v1 = vld [vmem:[#allocation2 + $0x48] sm:$0xff]  ;;  %1092 = vst.msk [vmem:[%s2248_s3 + $0x30] sm:$0xff] %vm761_vm2, %v1035_v32  ;;  %v864_v6 = vpop.xlane.xlu0 %863 }
 0x1e7   :  { %1528 = vlog2.f32 %v999_v1  ;;  %966 = vst.msk [vmem:[#allocation2 + $0x58] sm:$0xff] %vm761_vm2, %v933_v33  ;;  %v1519_v39 = vpop.eup %1518  ;;  %v934_v42 = vadd.f32 %v864_v6, %v806_v45 }
 0x1e8   :  { %1107 = vst.msk [vmem:[%s2248_s3 + $0xa8] sm:$0xff] %vm761_vm2, %v1065_v34  ;;  %v909_v26 = vpop.xlane.xlu1 %908  ;;  %v1067_v36 = vmul.f32 0.6931472, %v1519_v39  ;;  %v1000_v40 = vld [vmem:[#allocation2 + $0x50] sm:$0xff] }
 0x1e9   :  { %v1521_v30 = vpop.eup %1520  ;;  %v949_v44 = vadd.f32 %v909_v26, %v821_v37  ;;  %1530 = vlog2.f32 %v1000_v40  ;;  %967 = vst.msk [vmem:[#allocation2 + $0x60] sm:$0xff] %vm761_vm2, %v934_v42 }
 0x1ea   :  { %v1037_v48 = vmul.f32 0.6931472, %v1521_v30  ;;  %v1015_v50 = vld [vmem:[#allocation2 + $0xc8] sm:$0xff]  ;;  %1108 = vst.msk [vmem:[%s2248_s3 + $0xb0] sm:$0xff] %vm761_vm2, %v1067_v36  ;;  %v912_v54 = vpop.xlane.xlu0 %911 }
 0x1eb   :  { %1532 = vlog2.f32 %v1015_v50  ;;  %982 = vst.msk [vmem:[#allocation2 + $0xd8] sm:$0xff] %vm761_vm2, %v949_v44  ;;  %v1523_v55 = vpop.eup %1522  ;;  %v950_v57 = vadd.f32 %v912_v54, %v822_v47 }
 0x1ec   :  { %1093 = vst.msk [vmem:[%s2248_s3 + $0x38] sm:$0xff] %vm761_vm2, %v1037_v48  ;;  %v867_v58 = vpop.xlane.xlu1 %866  ;;  %v1039_v60 = vmul.f32 0.6931472, %v1523_v55  ;;  %v1016_v61 = vld [vmem:[#allocation2 + $0xd0] sm:$0xff] }
 0x1ed   :  { %v1525_v59 = vpop.eup %1524  ;;  %v935_v62 = vadd.f32 %v867_v58, %v807_v51  ;;  %1534 = vlog2.f32 %v1016_v61  ;;  %983 = vst.msk [vmem:[#allocation2 + $0xe0] sm:$0xff] %vm761_vm2, %v950_v57 }
 0x1ee   :  { %v1069_v5 = vmul.f32 0.6931472, %v1525_v59  ;;  %v1001_v8 = vld [vmem:[#allocation2 + $0x58] sm:$0xff]  ;;  %1094 = vst.msk [vmem:[%s2248_s3 + $0x40] sm:$0xff] %vm761_vm2, %v1039_v60  ;;  %v870_v11 = vpop.xlane.xlu0 %869 }
 0x1ef   :  { %1536 = vlog2.f32 %v1001_v8  ;;  %968 = vst.msk [vmem:[#allocation2 + $0x68] sm:$0xff] %vm761_vm2, %v935_v62  ;;  %v1527_v12 = vpop.eup %1526  ;;  %v936_v14 = vadd.f32 %v870_v11, %v808_v2 }
 0x1f0   :  { %1109 = vst.msk [vmem:[%s2248_s3 + $0xb8] sm:$0xff] %vm761_vm2, %v1069_v5  ;;  %v915_v13 = vpop.xlane.xlu1 %914  ;;  %v1071_v16 = vmul.f32 0.6931472, %v1527_v12  ;;  %v1002_v17 = vld [vmem:[#allocation2 + $0x60] sm:$0xff] }
 0x1f1   :  { %v1529_v15 = vpop.eup %1528  ;;  %v951_v49 = vadd.f32 %v915_v13, %v823_v9  ;;  %1538 = vlog2.f32 %v1002_v17  ;;  %969 = vst.msk [vmem:[#allocation2 + $0x70] sm:$0xff] %vm761_vm2, %v936_v14 }
 0x1f2   :  { %v1041_v18 = vmul.f32 0.6931472, %v1529_v15  ;;  %v1017_v63 = vld [vmem:[#allocation2 + $0xd8] sm:$0xff]  ;;  %1110 = vst.msk [vmem:[%s2248_s3 + $0xc0] sm:$0xff] %vm761_vm2, %v1071_v16  ;;  %v918_v21 = vpop.xlane.xlu0 %917 }
 0x1f3   :  { %1540 = vlog2.f32 %v1017_v63  ;;  %984 = vst.msk [vmem:[#allocation2 + $0xe8] sm:$0xff] %vm761_vm2, %v951_v49  ;;  %v1531_v19 = vpop.eup %1530  ;;  %v952_v22 = vadd.f32 %v918_v21, %v824_v53 }
 0x1f4   :  { %1095 = vst.msk [vmem:[%s2248_s3 + $0x48] sm:$0xff] %vm761_vm2, %v1041_v18  ;;  %v873_v35 = vpop.xlane.xlu1 %872  ;;  %v1043_v52 = vmul.f32 0.6931472, %v1531_v19  ;;  %v1018_v56 = vld [vmem:[#allocation2 + $0xe0] sm:$0xff] }
 0x1f5   :  { %v1533_v38 = vpop.eup %1532  ;;  %v937_v7 = vadd.f32 %v873_v35, %v809_v4  ;;  %1542 = vlog2.f32 %v1018_v56  ;;  %985 = vst.msk [vmem:[#allocation2 + $0xf0] sm:$0xff] %vm761_vm2, %v952_v22 }
 0x1f6   :  { %v1073_v10 = vmul.f32 0.6931472, %v1533_v38  ;;  %v1003_v25 = vld [vmem:[#allocation2 + $0x68] sm:$0xff]  ;;  %1096 = vst.msk [vmem:[%s2248_s3 + $0x50] sm:$0xff] %vm761_vm2, %v1043_v52 }
 0x1f7   :  { %1544 = vlog2.f32 %v1003_v25  ;;  %970 = vst.msk [vmem:[#allocation2 + $0x78] sm:$0xff] %vm761_vm2, %v937_v7  ;;  %v1535_v43 = vpop.eup %1534 }
 0x1f8   :  { %1111 = vst.msk [vmem:[%s2248_s3 + $0xc8] sm:$0xff] %vm761_vm2, %v1073_v10  ;;  %v921_v46 = vpop.xlane.xlu1 %920  ;;  %v1075_v0 = vmul.f32 0.6931472, %v1535_v43  ;;  %v1004_v27 = vld [vmem:[#allocation2 + $0x70] sm:$0xff] }
 0x1f9   :  { %v1537_v23 = vpop.eup %1536  ;;  %v953_v3 = vadd.f32 %v921_v46, %v825_v28  ;;  %1546 = vlog2.f32 %v1004_v27 }
 0x1fa   :  { %v1045_v29 = vmul.f32 0.6931472, %v1537_v23  ;;  %v1019_v20 = vld [vmem:[#allocation2 + $0xe8] sm:$0xff]  ;;  %1112 = vst.msk [vmem:[%s2248_s3 + $0xd0] sm:$0xff] %vm761_vm2, %v1075_v0 }
 0x1fb   :  { %1548 = vlog2.f32 %v1019_v20  ;;  %986 = vst.msk [vmem:[#allocation2 + $0xf8] sm:$0xff] %vm761_vm2, %v953_v3  ;;  %v1539_v31 = vpop.eup %1538 }
 0x1fc   :  { %1097 = vst.msk [vmem:[%s2248_s3 + $0x58] sm:$0xff] %vm761_vm2, %v1045_v29  ;;  %v1047_v32 = vmul.f32 0.6931472, %v1539_v31  ;;  %v1020_v41 = vld [vmem:[#allocation2 + $0xf0] sm:$0xff] }
 0x1fd   :  { %v1541_v24 = vpop.eup %1540  ;;  %1550 = vlog2.f32 %v1020_v41 }
 0x1fe   :  { %v1077_v33 = vmul.f32 0.6931472, %v1541_v24  ;;  %v1005_v45 = vld [vmem:[#allocation2 + $0x78] sm:$0xff]  ;;  %1098 = vst.msk [vmem:[%s2248_s3 + $0x60] sm:$0xff] %vm761_vm2, %v1047_v32 }
 0x1ff   :  { %1552 = vlog2.f32 %v1005_v45  ;;  %v1543_v34 = vpop.eup %1542 }
 0x200   :  { %1113 = vst.msk [vmem:[%s2248_s3 + $0xd8] sm:$0xff] %vm761_vm2, %v1077_v33  ;;  %v1079_v37 = vmul.f32 0.6931472, %v1543_v34 }
 0x201   :  { %v1545_v1 = vpop.eup %1544 }
 0x202   :  { %v1049_v6 = vmul.f32 0.6931472, %v1545_v1  ;;  %v1021_v39 = vld [vmem:[#allocation2 + $0xf8] sm:$0xff]  ;;  %1114 = vst.msk [vmem:[%s2248_s3 + $0xe0] sm:$0xff] %vm761_vm2, %v1079_v37 }
 0x203   :  { %1554 = vlog2.f32 %v1021_v39  ;;  %v1547_v26 = vpop.eup %1546 }
 0x204   :  { %1099 = vst.msk [vmem:[%s2248_s3 + $0x68] sm:$0xff] %vm761_vm2, %v1049_v6  ;;  %v1051_v30 = vmul.f32 0.6931472, %v1547_v26 }
 0x205   :  { %v1549_v42 = vpop.eup %1548 }
 0x206   :  { %v1081_v36 = vmul.f32 0.6931472, %v1549_v42  ;;  %1100 = vst.msk [vmem:[%s2248_s3 + $0x70] sm:$0xff] %vm761_vm2, %v1051_v30 }
 0x207   :  { %v1551_v40 = vpop.eup %1550 }
 0x208   :  { %1115 = vst.msk [vmem:[%s2248_s3 + $0xe8] sm:$0xff] %vm761_vm2, %v1081_v36  ;;  %v1083_v47 = vmul.f32 0.6931472, %v1551_v40 }
 0x209   :  { %v1553_v44 = vpop.eup %1552 }
 0x20a   :  { %v1053_v48 = vmul.f32 0.6931472, %v1553_v44  ;;  %1116 = vst.msk [vmem:[%s2248_s3 + $0xf0] sm:$0xff] %vm761_vm2, %v1083_v47 }
 0x20c   :  { %1101 = vst.msk [vmem:[%s2248_s3 + $0x78] sm:$0xff] %vm761_vm2, %v1053_v48 }
 0x20d   :  { %v1555_v50 = vpop.eup %1554 }
 0x20e   :  { %v1085_v51 = vmul.f32 0.6931472, %v1555_v50 }
 0x210   :  { %1117 = vst.msk [vmem:[%s2248_s3 + $0xf8] sm:$0xff] %vm761_vm2, %v1085_v51 }
 0x211   :  { %1578 = dma.done.wait [#allocation4], 32  }
 0x212   :  { %1579 = vsyncadd [#allocation4], 4294967264 }
 0x213   :  { %1135 = vsyncpa [#allocation4], 1 }

</bundles_post_ra>
